<compile_context>
chip_gen: v6e
topology: v6e:2x2x1
jax: 0.10.0
libtpu: 0.0.40
codegen_flags: <defaults>
</compile_context>

<pallas_src>
import functools

import jax
import jax.numpy as jnp
from jax.experimental import pallas as pl
from jax.experimental.pallas import tpu as pltpu


# ---------------------------------------------------------------------------
# Kernel
# ---------------------------------------------------------------------------
def _window_attn_kernel(x_ref, wqkv_ref, bqkv_ref, bias_ref, wp_ref, bp_ref,
                        o_ref, qkv_scr, ctx_scr, *,
                        windows_per_tile, tokens, num_heads, head_dim, dim):
    """One grid step = `windows_per_tile` windows (rows = tb * tokens).

    x_ref    : (rows, C)                 token tile (compute dtype)
    wqkv_ref : (C, 3C)                   fused qkv weight, q-scale folded in
    bqkv_ref : (1, 3C)  f32              fused qkv bias (q-scale folded in)
    bias_ref : (H, N, N) f32             relative-position bias (padded keys = -1e9)
    wp_ref   : (C, C_pad)                lane-padded proj weight
    bp_ref   : (1, C_pad) f32            lane-padded proj bias
    o_ref    : (rows, C_pad)             output tile
    qkv_scr  : (rows, 3C)  VMEM scratch  staged q|k|v
    ctx_scr  : (rows, C)   VMEM scratch  merged per-head context
    """
    cdt = x_ref.dtype
    f32 = jnp.float32
    tb, N, H, d, C = windows_per_tile, tokens, num_heads, head_dim, dim

    # Fused qkv projection: single MXU pass, f32 accumulation + bias.
    x = x_ref[...]
    qkv = jnp.dot(x, wqkv_ref[...], preferred_element_type=f32) + bqkv_ref[...]
    qkv_scr[...] = qkv.astype(cdt)

    # Batched attention: batch dim = windows-in-tile, static loop over heads.
    qk_dims = (((2,), (2,)), ((0,), (0,)))   # contract head_dim, batch over tb
    pv_dims = (((2,), (1,)), ((0,), (0,)))   # contract keys,     batch over tb

    for h in range(H):                       # short static unroll (<= num_heads)
        c0 = h * d
        qh = qkv_scr[:, c0:c0 + d].reshape(tb, N, d)
        kh = qkv_scr[:, C + c0:C + c0 + d].reshape(tb, N, d)
        vh = qkv_scr[:, 2 * C + c0:2 * C + c0 + d].reshape(tb, N, d)

        logits = jax.lax.dot_general(qh, kh, qk_dims,
                                     preferred_element_type=f32)
        logits = logits + bias_ref[h][None]              # (tb,N,N) + (1,N,N), f32
        logits = logits - jnp.max(logits, axis=-1, keepdims=True)
        p = jnp.exp(logits)
        p = p * pl.reciprocal(jnp.sum(p, axis=-1, keepdims=True), approx=True)

        ctx = jax.lax.dot_general(p.astype(cdt), vh, pv_dims,
                                  preferred_element_type=f32)
        ctx_scr[:, c0:c0 + d] = ctx.reshape(tb * N, d).astype(cdt)

    # Output projection into the lane-padded slab (+ f32 bias), lane-dense store.
    y = jnp.dot(ctx_scr[...], wp_ref[...], preferred_element_type=f32) + bp_ref[...]
    o_ref[...] = y.astype(o_ref.dtype)


# ---------------------------------------------------------------------------
# pallas_call builder
# ---------------------------------------------------------------------------
def _build_pallas_call(*, n_windows_padded, tokens, dim, dim_pad, num_heads,
                       head_dim, windows_per_tile, out_dtype, compute_dtype):
    tb = windows_per_tile
    rows = tb * tokens
    n_blocks = n_windows_padded // tb
    M = n_windows_padded * tokens

    kernel = functools.partial(
        _window_attn_kernel, windows_per_tile=tb, tokens=tokens,
        num_heads=num_heads, head_dim=head_dim, dim=dim)

    cd_size = jnp.dtype(compute_dtype).itemsize
    o_size = jnp.dtype(out_dtype).itemsize

    # Advisory cost estimate (helps XLA schedule surrounding ops).
    flops = (2 * M * dim * 3 * dim                       # fused qkv projection
             + 4 * n_windows_padded * tokens * tokens * dim   # q@k^T and attn@v
             + 2 * M * dim * dim_pad)                    # output projection
    transcendentals = n_windows_padded * num_heads * tokens * tokens
    bytes_accessed = (M * dim * cd_size
                      + (dim * 3 * dim + dim * dim_pad) * cd_size
                      + (3 * dim + dim_pad) * 4
                      + num_heads * tokens * tokens * 4
                      + M * dim_pad * o_size)

    # VMEM budget: double-buffered x/out tiles + weights + bias + scratch,
    # with margin, capped at 56 MiB so it is safe on v7x (64 MiB physical).
    vmem_est = (2 * rows * dim * cd_size
                + 2 * rows * dim_pad * o_size
                + 2 * (dim * 3 * dim + dim * dim_pad) * cd_size
                + 2 * (3 * dim + dim_pad) * 4
                + 2 * num_heads * tokens * tokens * 4
                + rows * 3 * dim * cd_size
                + rows * dim * cd_size)
    vmem_limit = int(min(max(2 * vmem_est, 32 << 20), 56 << 20))

    def const_spec(shape):
        n = len(shape)
        return pl.BlockSpec(shape, lambda *args, _n=n: (0,) * _n)

    return pl.pallas_call(
        kernel,
        out_shape=jax.ShapeDtypeStruct((M, dim_pad), out_dtype),
        grid_spec=pltpu.PrefetchScalarGridSpec(
            num_scalar_prefetch=0,
            grid=(n_blocks,),
            in_specs=[
                pl.BlockSpec((rows, dim), lambda i: (i, 0)),   # token tile
                const_spec((dim, 3 * dim)),                    # fused qkv weight
                const_spec((1, 3 * dim)),                      # fused qkv bias
                const_spec((num_heads, tokens, tokens)),       # rel-pos bias
                const_spec((dim, dim_pad)),                    # proj weight
                const_spec((1, dim_pad)),                      # proj bias
            ],
            out_specs=pl.BlockSpec((rows, dim_pad), lambda i: (i, 0)),
            scratch_shapes=[
                pltpu.VMEM((rows, 3 * dim), compute_dtype),    # staged q|k|v
                pltpu.VMEM((rows, dim), compute_dtype),        # merged context
            ],
        ),
        compiler_params=pltpu.CompilerParams(
            dimension_semantics=("parallel",),
            vmem_limit_bytes=vmem_limit),
        cost_estimate=pl.CostEstimate(
            flops=flops, transcendentals=transcendentals,
            bytes_accessed=bytes_accessed),
    )


# ---------------------------------------------------------------------------
# Wrapper (parameter re-layout + padding + tiling policy)
# ---------------------------------------------------------------------------
def _relative_position_index(window_size):
    wh, ww = window_size
    coords = jnp.stack(jnp.meshgrid(jnp.arange(wh), jnp.arange(ww), indexing="ij"))
    coords = coords.reshape(2, -1)                               # (2, N)
    rel = coords[:, :, None] - coords[:, None, :]                # (2, N, N)
    rel = jnp.transpose(rel, (1, 2, 0))                          # (N, N, 2)
    rel = rel.at[:, :, 0].add(wh - 1)
    rel = rel.at[:, :, 1].add(ww - 1)
    rel = rel.at[:, :, 0].multiply(2 * ww - 1)
    return rel.sum(-1)                                           # (N, N) int32


def window_attention(x, params, window_size, num_heads, *, mask=None,
                     qk_scale=None, windows_per_tile=None,
                     compute_dtype=jnp.bfloat16):
    """WindowAttention forward. x: (B_, N, C) with N = wh*ww tokens per window."""
    if mask is not None:
        # TODO(synk): fuse the SW-MSA per-window-group attention mask (added
        # before softmax); only the mask=None (W-MSA) path is implemented.
        raise NotImplementedError("mask is not supported by this Pallas kernel")

    B_, N, C = x.shape
    wh, ww = window_size
    assert N == wh * ww, (N, window_size)
    assert C % num_heads == 0, (C, num_heads)
    head_dim = C // num_heads
    scale = qk_scale or head_dim ** (-0.5)
    f32 = jnp.float32

    # Sublane-align the token count (e.g. real Swin N=49 -> 56).
    N_pad = ((N + 7) // 8) * 8
    # Lane-dense output: pad proj output channels up to a multiple of 128.
    C_pad = ((C + 127) // 128) * 128

    # --- fused qkv weight/bias, 1/sqrt(d) scale folded into the q block ------
    qkv_w = params["qkv_w"].astype(f32)          # (3C, C), PyTorch convention
    qkv_b = params["qkv_b"].astype(f32)          # (3C,)
    scale_vec = jnp.concatenate([jnp.full((C,), scale, f32), jnp.ones((2 * C,), f32)])
    wqkv = (qkv_w * scale_vec[:, None]).T.astype(compute_dtype)   # (C, 3C)
    bqkv = (qkv_b * scale_vec).reshape(1, 3 * C)                  # f32

    # --- relative-position bias: gather once -> (nH, N_pad, N_pad) f32 -------
    idx = _relative_position_index(window_size).reshape(-1)
    rel_bias = params["rpb_table"].astype(f32)[idx]
    rel_bias = rel_bias.reshape(N, N, num_heads).transpose(2, 0, 1)
    if N_pad > N:
        rel_bias = jnp.pad(rel_bias, ((0, 0), (0, N_pad - N), (0, N_pad - N)))
        rel_bias = rel_bias.at[:, :, N:].set(-1e9)   # mask padded key columns

    # --- output projection, lane padded ---------------------------------------
    wp = jnp.pad(params["proj_w"].astype(f32).T, ((0, 0), (0, C_pad - C)))
    wp = wp.astype(compute_dtype)
    bp = jnp.pad(params["proj_b"].astype(f32), (0, C_pad - C)).reshape(1, C_pad)

    # --- tiling policy: ~1024 rows/grid step, >= 4 even grid steps when possible
    if windows_per_tile is None:
        tb = max(1, 1024 // N_pad)
        if B_ >= 4:
            tb = min(tb, max(1, B_ // 4))
        tb = min(tb, B_)
    else:
        tb = max(1, min(int(windows_per_tile), B_))
    n_blocks = pl.cdiv(B_, tb)
    if n_blocks > 1 and n_blocks % 2:
        n_blocks += 1                       # even grid -> both v7x TCs busy
    B_pad = n_blocks * tb

    # --- pad tokens/windows and flatten to a row-major token slab ------------
    xp = x.astype(compute_dtype)
    if N_pad > N or B_pad > B_:
        xp = jnp.pad(xp, ((0, B_pad - B_), (0, N_pad - N), (0, 0)))
    x2 = xp.reshape(B_pad * N_pad, C)

    call = _build_pallas_call(
        n_windows_padded=B_pad, tokens=N_pad, dim=C, dim_pad=C_pad,
        num_heads=num_heads, head_dim=head_dim, windows_per_tile=tb,
        out_dtype=x.dtype, compute_dtype=compute_dtype)
    out = call(x2, wqkv, bqkv, rel_bias, wp, bp)

    return out.reshape(B_pad, N_pad, C_pad)[:B_, :N, :C]


# ---------------------------------------------------------------------------
# Parameters + pure-JAX reference (PyTorch semantics)
# ---------------------------------------------------------------------------
def init_params(key, dim, window_size, num_heads, dtype=jnp.float32):
    k1, k2, k3, k4, k5 = jax.random.split(key, 5)
    num_rel = (2 * window_size[0] - 1) * (2 * window_size[1] - 1)
    return {
        "qkv_w": jax.random.normal(k1, (3 * dim, dim), dtype) * 0.02,
        "qkv_b": jax.random.normal(k2, (3 * dim,), dtype) * 0.02,
        "proj_w": jax.random.normal(k3, (dim, dim), dtype) * 0.02,
        "proj_b": jax.random.normal(k4, (dim,), dtype) * 0.02,
        "rpb_table": jax.random.normal(k5, (num_rel, num_heads), dtype) * 0.02,
    }


def reference_window_attention(x, params, window_size, num_heads, qk_scale=None):
    B_, N, C = x.shape
    hd = C // num_heads
    scale = qk_scale or hd ** (-0.5)
    qkv = x @ params["qkv_w"].T + params["qkv_b"]
    qkv = qkv.reshape(B_, N, 3, num_heads, hd).transpose(2, 0, 3, 1, 4)
    q, k, v = qkv[0] * scale, qkv[1], qkv[2]
    attn = q @ jnp.swapaxes(k, -1, -2)                            # (B_, nH, N, N)
    idx = _relative_position_index(window_size).reshape(-1)
    bias = params["rpb_table"][idx].reshape(N, N, num_heads).transpose(2, 0, 1)
    attn = jax.nn.softmax(attn + bias[None], axis=-1)
    out = (attn @ v).transpose(0, 2, 1, 3).reshape(B_, N, C)
    return out @ params["proj_w"].T + params["proj_b"]


# ---------------------------------------------------------------------------
# Demo
# ---------------------------------------------------------------------------
if __name__ == "__main__":
    key = jax.random.PRNGKey(0)
    kx, kp, kx2, kp2 = jax.random.split(key, 4)

    # Case 1: 4x4 window (N=16, already sublane aligned), 8 windows.
    dim, window_size, num_heads = 32, (4, 4), 4
    N = window_size[0] * window_size[1]
    num_windows = 8

    x = jax.random.normal(kx, (num_windows, N, dim), jnp.float32)
    params = init_params(kp, dim, window_size, num_heads)
    ref = reference_window_attention(x, params, window_size, num_heads)

    # f32 MXU operands: tight correctness check.
    out_f32 = jax.block_until_ready(window_attention(
        x, params, window_size, num_heads, compute_dtype=jnp.float32))
    assert out_f32.shape == (num_windows, N, dim), out_f32.shape
    err = float(jnp.max(jnp.abs(out_f32 - ref)))
    assert err < 1e-3, err

    # bf16 MXU operands with f32 accumulation: default fast path (looser check).
    out_bf16 = jax.block_until_ready(window_attention(
        x, params, window_size, num_heads))
    err_b = float(jnp.max(jnp.abs(out_bf16 - ref)))
    assert err_b < 5e-2, err_b

    # Case 2: 3x3 window (N=9 -> padded to 16), exercises token padding/masking.
    window_size2, num_windows2 = (3, 3), 6
    N2 = window_size2[0] * window_size2[1]
    x2 = jax.random.normal(kx2, (num_windows2, N2, dim), jnp.float32)
    params2 = init_params(kp2, dim, window_size2, num_heads)
    ref2 = reference_window_attention(x2, params2, window_size2, num_heads)
    out2 = jax.block_until_ready(window_attention(
        x2, params2, window_size2, num_heads, compute_dtype=jnp.float32))
    err2 = float(jnp.max(jnp.abs(out2 - ref2)))
    assert out2.shape == (num_windows2, N2, dim), out2.shape
    assert err2 < 1e-3, err2

    print("KERNEL_OK")
</pallas_src>

<mosaic_0001>
module attributes {stable_mosaic.version = 11 : i64} {
  func.func @_window_attn_kernel(%arg0: i32, %arg1: memref<32x32xf32, #tpu.memory_space<vmem>>, %arg2: memref<32x96xf32, #tpu.memory_space<vmem>>, %arg3: memref<1x96xf32, #tpu.memory_space<vmem>>, %arg4: memref<4x16x16xf32, #tpu.memory_space<vmem>>, %arg5: memref<32x128xf32, #tpu.memory_space<vmem>>, %arg6: memref<1x128xf32, #tpu.memory_space<vmem>>, %arg7: memref<32x128xf32, #tpu.memory_space<vmem>>, %arg8: memref<32x96xf32, #tpu.memory_space<vmem>>, %arg9: memref<32x32xf32, #tpu.memory_space<vmem>>) attributes {dimension_semantics = [#tpu.dimension_semantics<parallel>], iteration_bounds = array<i64: 4>, scalar_prefetch = 0 : i64, scratch_operands = 2 : i64, tpu.core_type = #tpu.core_type<tc>, window_params = [{transform_indices = @transform_0, window_bounds = array<i64: 32, 32>}, {pipeline_mode = #tpu.pipeline_mode<synchronous>, transform_indices = @transform_1, window_bounds = array<i64: 32, 96>}, {pipeline_mode = #tpu.pipeline_mode<synchronous>, transform_indices = @transform_2, window_bounds = array<i64: 1, 96>}, {pipeline_mode = #tpu.pipeline_mode<synchronous>, transform_indices = @transform_3, window_bounds = array<i64: 4, 16, 16>}, {pipeline_mode = #tpu.pipeline_mode<synchronous>, transform_indices = @transform_4, window_bounds = array<i64: 32, 128>}, {pipeline_mode = #tpu.pipeline_mode<synchronous>, transform_indices = @transform_5, window_bounds = array<i64: 1, 128>}, {transform_indices = @transform_6, window_bounds = array<i64: 32, 128>}]} {
    %c0 = arith.constant 0 : index
    %c0_0 = arith.constant 0 : index
    %0 = vector.load %arg1[%c0, %c0_0] : memref<32x32xf32, #tpu.memory_space<vmem>>, vector<32x32xf32>
    %c0_1 = arith.constant 0 : index
    %c0_2 = arith.constant 0 : index
    %1 = vector.load %arg2[%c0_1, %c0_2] : memref<32x96xf32, #tpu.memory_space<vmem>>, vector<32x96xf32>
    %cst = arith.constant dense<0.000000e+00> : vector<32x96xf32>
    %2 = tpu.matmul %0, %1, %cst {dimension_numbers = #tpu.dot_dimension_numbers<[1], [0], [0], [1], [0, 0, 1, 1], [], []>} : vector<32x32xf32>, vector<32x96xf32>, vector<32x96xf32> -> vector<32x96xf32>
    %c0_3 = arith.constant 0 : index
    %c0_4 = arith.constant 0 : index
    %3 = vector.load %arg3[%c0_3, %c0_4] : memref<1x96xf32, #tpu.memory_space<vmem>>, vector<1x96xf32>
    %4 = vector.broadcast %3 : vector<1x96xf32> to vector<32x96xf32>
    %5 = arith.addf %2, %4 : vector<32x96xf32>
    %c0_5 = arith.constant 0 : index
    %c0_6 = arith.constant 0 : index
    %6 = vector.load %arg8[%c0_5, %c0_6] : memref<32x96xf32, #tpu.memory_space<vmem>>, vector<32x96xf32>
    tpu.vector_store %arg8[%c0_5, %c0_6], %5 {strides = array<i32>} : memref<32x96xf32, #tpu.memory_space<vmem>>, vector<32x96xf32>,
    %c0_7 = arith.constant 0 : index
    %c0_8 = arith.constant 0 : index
    %7 = vector.load %arg8[%c0_7, %c0_8] : memref<32x96xf32, #tpu.memory_space<vmem>>, vector<32x8xf32>
    %8 = vector.shape_cast %7 : vector<32x8xf32> to vector<2x16x8xf32>
    %c0_9 = arith.constant 0 : index
    %c32 = arith.constant 32 : index
    %9 = vector.load %arg8[%c0_9, %c32] : memref<32x96xf32, #tpu.memory_space<vmem>>, vector<32x8xf32>
    %10 = vector.shape_cast %9 : vector<32x8xf32> to vector<2x16x8xf32>
    %c0_10 = arith.constant 0 : index
    %c64 = arith.constant 64 : index
    %11 = vector.load %arg8[%c0_10, %c64] : memref<32x96xf32, #tpu.memory_space<vmem>>, vector<32x8xf32>
    %12 = vector.shape_cast %11 : vector<32x8xf32> to vector<2x16x8xf32>
    %cst_11 = arith.constant dense<0.000000e+00> : vector<2x16x16xf32>
    %13 = tpu.matmul %8, %10, %cst_11 {dimension_numbers = #tpu.dot_dimension_numbers<[2], [2], [1], [1], [0, 0, 0, 1, 1, 1], [0], [0]>} : vector<2x16x8xf32>, vector<2x16x8xf32>, vector<2x16x16xf32> -> vector<2x16x16xf32>
    %c0_12 = arith.constant 0 : index
    %c0_13 = arith.constant 0 : index
    %c0_14 = arith.constant 0 : index
    %14 = vector.load %arg4[%c0_12, %c0_13, %c0_14] : memref<4x16x16xf32, #tpu.memory_space<vmem>>, vector<1x16x16xf32>
    %15 = vector.shape_cast %14 : vector<1x16x16xf32> to vector<16x16xf32>
    %16 = vector.shape_cast %15 : vector<16x16xf32> to vector<1x16x16xf32>
    %17 = vector.broadcast %16 : vector<1x16x16xf32> to vector<2x16x16xf32>
    %18 = arith.addf %13, %17 : vector<2x16x16xf32>
    %cst_15 = arith.constant dense<0xFF800000> : vector<2x16xf32>
    %19 = vector.multi_reduction <maximumf>, %18, %cst_15 [2] : vector<2x16x16xf32> to vector<2x16xf32>
    %20 = vector.shape_cast %19 : vector<2x16xf32> to vector<2x16x1xf32>
    %21 = vector.broadcast %20 : vector<2x16x1xf32> to vector<2x16x16xf32>
    %22 = arith.subf %18, %21 : vector<2x16x16xf32>
    %23 = math.exp %22 : vector<2x16x16xf32>
    %cst_16 = arith.constant dense<0.000000e+00> : vector<2x16xf32>
    %24 = vector.multi_reduction <add>, %23, %cst_16 [2] : vector<2x16x16xf32> to vector<2x16xf32>
    %25 = vector.shape_cast %24 : vector<2x16xf32> to vector<2x16x1xf32>
    %26 = tpu.reciprocal %25 {approx = true} : vector<2x16x1xf32> -> vector<2x16x1xf32>
    %27 = vector.broadcast %26 : vector<2x16x1xf32> to vector<2x16x16xf32>
    %28 = arith.mulf %23, %27 : vector<2x16x16xf32>
    %cst_17 = arith.constant dense<0.000000e+00> : vector<2x16x8xf32>
    %29 = tpu.matmul %28, %12, %cst_17 {dimension_numbers = #tpu.dot_dimension_numbers<[2], [1], [1], [2], [0, 0, 0, 1, 1, 2], [0], [0]>} : vector<2x16x16xf32>, vector<2x16x8xf32>, vector<2x16x8xf32> -> vector<2x16x8xf32>
    %30 = vector.shape_cast %29 : vector<2x16x8xf32> to vector<32x8xf32>
    %c0_18 = arith.constant 0 : index
    %c0_19 = arith.constant 0 : index
    %31 = vector.load %arg9[%c0_18, %c0_19] : memref<32x32xf32, #tpu.memory_space<vmem>>, vector<32x8xf32>
    tpu.vector_store %arg9[%c0_18, %c0_19], %30 {strides = array<i32>} : memref<32x32xf32, #tpu.memory_space<vmem>>, vector<32x8xf32>,
    %c0_20 = arith.constant 0 : index
    %c8 = arith.constant 8 : index
    %32 = vector.load %arg8[%c0_20, %c8] : memref<32x96xf32, #tpu.memory_space<vmem>>, vector<32x8xf32>
    %33 = vector.shape_cast %32 : vector<32x8xf32> to vector<2x16x8xf32>
    %c0_21 = arith.constant 0 : index
    %c40 = arith.constant 40 : index
    %34 = vector.load %arg8[%c0_21, %c40] : memref<32x96xf32, #tpu.memory_space<vmem>>, vector<32x8xf32>
    %35 = vector.shape_cast %34 : vector<32x8xf32> to vector<2x16x8xf32>
    %c0_22 = arith.constant 0 : index
    %c72 = arith.constant 72 : index
    %36 = vector.load %arg8[%c0_22, %c72] : memref<32x96xf32, #tpu.memory_space<vmem>>, vector<32x8xf32>
    %37 = vector.shape_cast %36 : vector<32x8xf32> to vector<2x16x8xf32>
    %cst_23 = arith.constant dense<0.000000e+00> : vector<2x16x16xf32>
    %38 = tpu.matmul %33, %35, %cst_23 {dimension_numbers = #tpu.dot_dimension_numbers<[2], [2], [1], [1], [0, 0, 0, 1, 1, 1], [0], [0]>} : vector<2x16x8xf32>, vector<2x16x8xf32>, vector<2x16x16xf32> -> vector<2x16x16xf32>
    %c1 = arith.constant 1 : index
    %c0_24 = arith.constant 0 : index
    %c0_25 = arith.constant 0 : index
    %39 = vector.load %arg4[%c1, %c0_24, %c0_25] : memref<4x16x16xf32, #tpu.memory_space<vmem>>, vector<1x16x16xf32>
    %40 = vector.shape_cast %39 : vector<1x16x16xf32> to vector<16x16xf32>
    %41 = vector.shape_cast %40 : vector<16x16xf32> to vector<1x16x16xf32>
    %42 = vector.broadcast %41 : vector<1x16x16xf32> to vector<2x16x16xf32>
    %43 = arith.addf %38, %42 : vector<2x16x16xf32>
    %cst_26 = arith.constant dense<0xFF800000> : vector<2x16xf32>
    %44 = vector.multi_reduction <maximumf>, %43, %cst_26 [2] : vector<2x16x16xf32> to vector<2x16xf32>
    %45 = vector.shape_cast %44 : vector<2x16xf32> to vector<2x16x1xf32>
    %46 = vector.broadcast %45 : vector<2x16x1xf32> to vector<2x16x16xf32>
    %47 = arith.subf %43, %46 : vector<2x16x16xf32>
    %48 = math.exp %47 : vector<2x16x16xf32>
    %cst_27 = arith.constant dense<0.000000e+00> : vector<2x16xf32>
    %49 = vector.multi_reduction <add>, %48, %cst_27 [2] : vector<2x16x16xf32> to vector<2x16xf32>
    %50 = vector.shape_cast %49 : vector<2x16xf32> to vector<2x16x1xf32>
    %51 = tpu.reciprocal %50 {approx = true} : vector<2x16x1xf32> -> vector<2x16x1xf32>
    %52 = vector.broadcast %51 : vector<2x16x1xf32> to vector<2x16x16xf32>
    %53 = arith.mulf %48, %52 : vector<2x16x16xf32>
    %cst_28 = arith.constant dense<0.000000e+00> : vector<2x16x8xf32>
    %54 = tpu.matmul %53, %37, %cst_28 {dimension_numbers = #tpu.dot_dimension_numbers<[2], [1], [1], [2], [0, 0, 0, 1, 1, 2], [0], [0]>} : vector<2x16x16xf32>, vector<2x16x8xf32>, vector<2x16x8xf32> -> vector<2x16x8xf32>
    %55 = vector.shape_cast %54 : vector<2x16x8xf32> to vector<32x8xf32>
    %c0_29 = arith.constant 0 : index
    %c8_30 = arith.constant 8 : index
    %56 = vector.load %arg9[%c0_29, %c8_30] : memref<32x32xf32, #tpu.memory_space<vmem>>, vector<32x8xf32>
    tpu.vector_store %arg9[%c0_29, %c8_30], %55 {strides = array<i32>} : memref<32x32xf32, #tpu.memory_space<vmem>>, vector<32x8xf32>,
    %c0_31 = arith.constant 0 : index
    %c16 = arith.constant 16 : index
    %57 = vector.load %arg8[%c0_31, %c16] : memref<32x96xf32, #tpu.memory_space<vmem>>, vector<32x8xf32>
    %58 = vector.shape_cast %57 : vector<32x8xf32> to vector<2x16x8xf32>
    %c0_32 = arith.constant 0 : index
    %c48 = arith.constant 48 : index
    %59 = vector.load %arg8[%c0_32, %c48] : memref<32x96xf32, #tpu.memory_space<vmem>>, vector<32x8xf32>
    %60 = vector.shape_cast %59 : vector<32x8xf32> to vector<2x16x8xf32>
    %c0_33 = arith.constant 0 : index
    %c80 = arith.constant 80 : index
    %61 = vector.load %arg8[%c0_33, %c80] : memref<32x96xf32, #tpu.memory_space<vmem>>, vector<32x8xf32>
    %62 = vector.shape_cast %61 : vector<32x8xf32> to vector<2x16x8xf32>
    %cst_34 = arith.constant dense<0.000000e+00> : vector<2x16x16xf32>
    %63 = tpu.matmul %58, %60, %cst_34 {dimension_numbers = #tpu.dot_dimension_numbers<[2], [2], [1], [1], [0, 0, 0, 1, 1, 1], [0], [0]>} : vector<2x16x8xf32>, vector<2x16x8xf32>, vector<2x16x16xf32> -> vector<2x16x16xf32>
    %c2 = arith.constant 2 : index
    %c0_35 = arith.constant 0 : index
    %c0_36 = arith.constant 0 : index
    %64 = vector.load %arg4[%c2, %c0_35, %c0_36] : memref<4x16x16xf32, #tpu.memory_space<vmem>>, vector<1x16x16xf32>
    %65 = vector.shape_cast %64 : vector<1x16x16xf32> to vector<16x16xf32>
    %66 = vector.shape_cast %65 : vector<16x16xf32> to vector<1x16x16xf32>
    %67 = vector.broadcast %66 : vector<1x16x16xf32> to vector<2x16x16xf32>
    %68 = arith.addf %63, %67 : vector<2x16x16xf32>
    %cst_37 = arith.constant dense<0xFF800000> : vector<2x16xf32>
    %69 = vector.multi_reduction <maximumf>, %68, %cst_37 [2] : vector<2x16x16xf32> to vector<2x16xf32>
    %70 = vector.shape_cast %69 : vector<2x16xf32> to vector<2x16x1xf32>
    %71 = vector.broadcast %70 : vector<2x16x1xf32> to vector<2x16x16xf32>
    %72 = arith.subf %68, %71 : vector<2x16x16xf32>
    %73 = math.exp %72 : vector<2x16x16xf32>
    %cst_38 = arith.constant dense<0.000000e+00> : vector<2x16xf32>
    %74 = vector.multi_reduction <add>, %73, %cst_38 [2] : vector<2x16x16xf32> to vector<2x16xf32>
    %75 = vector.shape_cast %74 : vector<2x16xf32> to vector<2x16x1xf32>
    %76 = tpu.reciprocal %75 {approx = true} : vector<2x16x1xf32> -> vector<2x16x1xf32>
    %77 = vector.broadcast %76 : vector<2x16x1xf32> to vector<2x16x16xf32>
    %78 = arith.mulf %73, %77 : vector<2x16x16xf32>
    %cst_39 = arith.constant dense<0.000000e+00> : vector<2x16x8xf32>
    %79 = tpu.matmul %78, %62, %cst_39 {dimension_numbers = #tpu.dot_dimension_numbers<[2], [1], [1], [2], [0, 0, 0, 1, 1, 2], [0], [0]>} : vector<2x16x16xf32>, vector<2x16x8xf32>, vector<2x16x8xf32> -> vector<2x16x8xf32>
    %80 = vector.shape_cast %79 : vector<2x16x8xf32> to vector<32x8xf32>
    %c0_40 = arith.constant 0 : index
    %c16_41 = arith.constant 16 : index
    %81 = vector.load %arg9[%c0_40, %c16_41] : memref<32x32xf32, #tpu.memory_space<vmem>>, vector<32x8xf32>
    tpu.vector_store %arg9[%c0_40, %c16_41], %80 {strides = array<i32>} : memref<32x32xf32, #tpu.memory_space<vmem>>, vector<32x8xf32>,
    %c0_42 = arith.constant 0 : index
    %c24 = arith.constant 24 : index
    %82 = vector.load %arg8[%c0_42, %c24] : memref<32x96xf32, #tpu.memory_space<vmem>>, vector<32x8xf32>
    %83 = vector.shape_cast %82 : vector<32x8xf32> to vector<2x16x8xf32>
    %c0_43 = arith.constant 0 : index
    %c56 = arith.constant 56 : index
    %84 = vector.load %arg8[%c0_43, %c56] : memref<32x96xf32, #tpu.memory_space<vmem>>, vector<32x8xf32>
    %85 = vector.shape_cast %84 : vector<32x8xf32> to vector<2x16x8xf32>
    %c0_44 = arith.constant 0 : index
    %c88 = arith.constant 88 : index
    %86 = vector.load %arg8[%c0_44, %c88] : memref<32x96xf32, #tpu.memory_space<vmem>>, vector<32x8xf32>
    %87 = vector.shape_cast %86 : vector<32x8xf32> to vector<2x16x8xf32>
    %cst_45 = arith.constant dense<0.000000e+00> : vector<2x16x16xf32>
    %88 = tpu.matmul %83, %85, %cst_45 {dimension_numbers = #tpu.dot_dimension_numbers<[2], [2], [1], [1], [0, 0, 0, 1, 1, 1], [0], [0]>} : vector<2x16x8xf32>, vector<2x16x8xf32>, vector<2x16x16xf32> -> vector<2x16x16xf32>
    %c3 = arith.constant 3 : index
    %c0_46 = arith.constant 0 : index
    %c0_47 = arith.constant 0 : index
    %89 = vector.load %arg4[%c3, %c0_46, %c0_47] : memref<4x16x16xf32, #tpu.memory_space<vmem>>, vector<1x16x16xf32>
    %90 = vector.shape_cast %89 : vector<1x16x16xf32> to vector<16x16xf32>
    %91 = vector.shape_cast %90 : vector<16x16xf32> to vector<1x16x16xf32>
    %92 = vector.broadcast %91 : vector<1x16x16xf32> to vector<2x16x16xf32>
    %93 = arith.addf %88, %92 : vector<2x16x16xf32>
    %cst_48 = arith.constant dense<0xFF800000> : vector<2x16xf32>
    %94 = vector.multi_reduction <maximumf>, %93, %cst_48 [2] : vector<2x16x16xf32> to vector<2x16xf32>
    %95 = vector.shape_cast %94 : vector<2x16xf32> to vector<2x16x1xf32>
    %96 = vector.broadcast %95 : vector<2x16x1xf32> to vector<2x16x16xf32>
    %97 = arith.subf %93, %96 : vector<2x16x16xf32>
    %98 = math.exp %97 : vector<2x16x16xf32>
    %cst_49 = arith.constant dense<0.000000e+00> : vector<2x16xf32>
    %99 = vector.multi_reduction <add>, %98, %cst_49 [2] : vector<2x16x16xf32> to vector<2x16xf32>
    %100 = vector.shape_cast %99 : vector<2x16xf32> to vector<2x16x1xf32>
    %101 = tpu.reciprocal %100 {approx = true} : vector<2x16x1xf32> -> vector<2x16x1xf32>
    %102 = vector.broadcast %101 : vector<2x16x1xf32> to vector<2x16x16xf32>
    %103 = arith.mulf %98, %102 : vector<2x16x16xf32>
    %cst_50 = arith.constant dense<0.000000e+00> : vector<2x16x8xf32>
    %104 = tpu.matmul %103, %87, %cst_50 {dimension_numbers = #tpu.dot_dimension_numbers<[2], [1], [1], [2], [0, 0, 0, 1, 1, 2], [0], [0]>} : vector<2x16x16xf32>, vector<2x16x8xf32>, vector<2x16x8xf32> -> vector<2x16x8xf32>
    %105 = vector.shape_cast %104 : vector<2x16x8xf32> to vector<32x8xf32>
    %c0_51 = arith.constant 0 : index
    %c24_52 = arith.constant 24 : index
    %106 = vector.load %arg9[%c0_51, %c24_52] : memref<32x32xf32, #tpu.memory_space<vmem>>, vector<32x8xf32>
    tpu.vector_store %arg9[%c0_51, %c24_52], %105 {strides = array<i32>} : memref<32x32xf32, #tpu.memory_space<vmem>>, vector<32x8xf32>,
    %c0_53 = arith.constant 0 : index
    %c0_54 = arith.constant 0 : index
    %107 = vector.load %arg9[%c0_53, %c0_54] : memref<32x32xf32, #tpu.memory_space<vmem>>, vector<32x32xf32>
    %c0_55 = arith.constant 0 : index
    %c0_56 = arith.constant 0 : index
    %108 = vector.load %arg5[%c0_55, %c0_56] : memref<32x128xf32, #tpu.memory_space<vmem>>, vector<32x128xf32>
    %cst_57 = arith.constant dense<0.000000e+00> : vector<32x128xf32>
    %109 = tpu.matmul %107, %108, %cst_57 {dimension_numbers = #tpu.dot_dimension_numbers<[1], [0], [0], [1], [0, 0, 1, 1], [], []>} : vector<32x32xf32>, vector<32x128xf32>, vector<32x128xf32> -> vector<32x128xf32>
    %c0_58 = arith.constant 0 : index
    %c0_59 = arith.constant 0 : index
    %110 = vector.load %arg6[%c0_58, %c0_59] : memref<1x128xf32, #tpu.memory_space<vmem>>, vector<1x128xf32>
    %111 = vector.broadcast %110 : vector<1x128xf32> to vector<32x128xf32>
    %112 = arith.addf %109, %111 : vector<32x128xf32>
    %c0_60 = arith.constant 0 : index
    %c0_61 = arith.constant 0 : index
    %113 = vector.load %arg7[%c0_60, %c0_61] : memref<32x128xf32, #tpu.memory_space<vmem>>, vector<32x128xf32>
    tpu.vector_store %arg7[%c0_60, %c0_61], %112 {strides = array<i32>} : memref<32x128xf32, #tpu.memory_space<vmem>>, vector<32x128xf32>,
    return
  }
  func.func @transform_0(%arg0: i32) -> (i32, i32) {
    %c0_i32 = arith.constant 0 : i32
    %c0_i32_0 = arith.constant 0 : i32
    return %arg0, %c0_i32 : i32, i32
  }
  func.func @transform_1(%arg0: i32) -> (i32, i32) {
    %c0_i32 = arith.constant 0 : i32
    %c0_i32_0 = arith.constant 0 : i32
    %c0_i32_1 = arith.constant 0 : i32
    return %c0_i32, %c0_i32_0 : i32, i32
  }
  func.func @transform_2(%arg0: i32) -> (i32, i32) {
    %c0_i32 = arith.constant 0 : i32
    %c0_i32_0 = arith.constant 0 : i32
    %c0_i32_1 = arith.constant 0 : i32
    return %c0_i32, %c0_i32_0 : i32, i32
  }
  func.func @transform_3(%arg0: i32) -> (i32, i32, i32) {
    %c0_i32 = arith.constant 0 : i32
    %c0_i32_0 = arith.constant 0 : i32
    %c0_i32_1 = arith.constant 0 : i32
    %c0_i32_2 = arith.constant 0 : i32
    return %c0_i32, %c0_i32_0, %c0_i32_1 : i32, i32, i32
  }
  func.func @transform_4(%arg0: i32) -> (i32, i32) {
    %c0_i32 = arith.constant 0 : i32
    %c0_i32_0 = arith.constant 0 : i32
    %c0_i32_1 = arith.constant 0 : i32
    return %c0_i32, %c0_i32_0 : i32, i32
  }
  func.func @transform_5(%arg0: i32) -> (i32, i32) {
    %c0_i32 = arith.constant 0 : i32
    %c0_i32_0 = arith.constant 0 : i32
    %c0_i32_1 = arith.constant 0 : i32
    return %c0_i32, %c0_i32_0 : i32, i32
  }
  func.func @transform_6(%arg0: i32) -> (i32, i32) {
    %c0_i32 = arith.constant 0 : i32
    %c0_i32_0 = arith.constant 0 : i32
    return %arg0, %c0_i32 : i32, i32
  }
}

</mosaic_0001>

<bundles_post_ra>
// kernel: tpu_custom_call.1
= control target key start
LH: loop header
LB: loop body
LE: loop exit
PB: predicated region body
PF: predicated region fallthrough
CT: control target
= control target key end

     0   :  { %11 = vsyncpa [#allocation5], 0  ;;  %s3161_s0 = inlined_call_operand.vmem [shape: f32[128,32], index: 0, kind: input, shape index: {}]   ;;  %s3162_s1 = inlined_call_operand.vmem [shape: f32[32,96], index: 1, kind: input, shape index: {}]   ;;  %s3163_s2 = inlined_call_operand.vmem [shape: f32[1,96], index: 2, kind: input, shape index: {}]   ;;  %s3164_s3 = inlined_call_operand.vmem [shape: f32[4,16,16], index: 3, kind: input, shape index: {}]   ;;  %s3165_s4 = inlined_call_operand.vmem [shape: f32[32,128], index: 4, kind: input, shape index: {}]   ;;  %s3166_s5 = inlined_call_operand.vmem [shape: f32[1,128], index: 5, kind: input, shape index: {}]   ;;  %s3167_s6 = inlined_call_operand.hbm [shape: f32[128,128], index: 6, kind: output, shape index: {}]  }
   0x1   :  { %13 = vsyncpa [#allocation5 + $0x1], 0  ;;  %s2795_s21 = smov 0   ;;  %s2797_s22 = smov 0  }
   0x2   :  { %s2799_s23 = smov 0   ;;  %s2801_s24 = smov 0  }
   0x3 LB: > { %s2816_s25 = sadd.s32 4294967295, %s2742_s24   ;;  %s2267_s26 = sadd.s32 4294967294, %s2742_s24   ;;  %s2742_s24 = sphi %s2801_s24, %s3173_s24   ;;  %s2738_s23 = sphi %s2799_s23, %s3172_s23   ;;  %s2734_s22 = sphi %s2797_s22, %s3171_s22   ;;  %s2730_s21 = sphi %s2795_s21, %s3170_s21  }
   0x4   : > { %s2820_s27 = sadd.s32 1, %s2742_s24   ;;  %s157_s28 = sadd.s32 1, %s2738_s23 }
   0x5   : > { %s154_s29 = ssub.s32 %s2742_s24, %s2820_s27  ;;  %p167_p0 = scmp.ne.s32.totalorder %s2738_s23, %s2734_s22 }
   0x6   : > { %p155_p1 = scmp.eq.s32.totalorder %s154_s29, 0  ;;  %p168_p2 = scmp.eq.s32.totalorder %s2816_s25, 3 }
   0x7   : > { %p173_p3 = scmp.ne.s32.totalorder %s2734_s22, %s2730_s21  ;;  %p174_p4 = scmp.eq.s32.totalorder %s2267_s26, 3 }
   0x8   : > { %s2831_s30 = scalar_select %p155_p1, %s2738_s23, %s157_s28  }
   0x9   : > { %p2833_p5 = por %p168_p2, %p167_p0  ;;  %p2837_p6 = por %p174_p4, %p173_p3 }
   0xa   : > { %p2270_p7 = scmp.ge.s32.totalorder %s2742_s24, 1  ;;  %p216_p8 = scmp.lt.s32.totalorder %s2742_s24, 5 }
   0xc   : > { %p217_p9 = pnand %p2270_p7, %p216_p8 }
   0xd   : > { %s2272_s13 = sshll.u32 (!%p217_p9), %s2816_s25, 2  ;;  %s2744_s9 = smov (!%p217_p9), 96  }
   0xe   : > { %220 = sbr.rel (%p217_p9) target bundleno = 3079 (0xc07), region = 44  ;;  %p247_p10 = scmp.lt.s32.totalorder (!%p217_p9), %s2272_s13, 15 }
   0xf   : > { %s2745_s14 = smov (!%p217_p9), 64   ;;  %s2746_s15 = smov (!%p217_p9), 88  }
  0x10   : > { %s2747_s16 = smov (!%p217_p9), 120   ;;  %s2749_s28 = smov (!%p217_p9), 80  }
  0x11   : > { %s2750_s29 = smov (!%p217_p9), 112   ;;  %s2754_s20 = smov (!%p217_p9), 40  }
  0x12   : > { %s243_s17 = sand.u32 (!%p217_p9), 1, %s2734_s22  }
  0x13   : > { %v260_v0 = vld [vmem:[%s3162_s1 + $0x18] sm:$0xff]  ;;  %v259_v1 = vld [vmem:[%s3162_s1 + $0x10] sm:$0xff]  ;;  %v258_v2 = vld [vmem:[%s3162_s1 + $0x8] sm:$0xff]  ;;  %s3175_s13 = smov (!%p247_p10, %s2272_s13), 15  ;;  %vm268_vm0 = vcmask 261120   ;;  %vm366_vm1 = vcmask 785408  }
  0x14   : > { %2424 = vmatprep.subr.mxu1 %v260_v0  ;;  %v257_v3 = vld [vmem:[%s3162_s1] sm:$0xff]  ;;  %s2273_s18 = sshll.u32 %s3175_s13, 3  ;;  %vm383_vm2 = vcmask 64512   ;;  %v376_v25 = vld [vmem:[%s3164_s3 + $0x8] sm:$0xff]  ;;  %vm556_vm3 = vcmask 130048   ;;  %s2751_s13 = smov 48  }
  0x15   : > { %2425 = vmatpush3.msra.mxu1 %v260_v0  ;;  %s250_s26 = scalar_lea.vmem %s3161_s0, %s2273_s18  ;;  %v2274_v8 = vld [vmem:[%s3163_s2] ss:$0 sm:$0xff]  ;;  %vm1206_vm4 = vcmask 130112   ;;  %vm1638_vm5 = vcmask 195712   ;;  %vm2070_vm6 = vcmask 261312   ;;  %s2271_s18 = sshll.u32 %s243_s17, 5 }
  0x16   : > { %2426 = vmatprep.subr.mxu1 %v259_v1  ;;  %v253_v4 = vld [vmem:[%s250_s26] sm:$0xff]  ;;  %v254_v5 = vld [vmem:[%s250_s26 + $0x8] sm:$0xff]  ;;  %v255_v6 = vld [vmem:[%s250_s26 + $0x10] sm:$0xff] }
  0x17   : > { %2427 = vmatpush3.msra.mxu1 %v259_v1  ;;  %2432 = vmatprep.mubr.msk.f32.mxu1 %vm268_vm0, %v253_v4  ;;  %v256_v7 = vld [vmem:[%s250_s26 + $0x18] sm:$0xff]  ;;  %v375_v27 = vld [vmem:[%s3164_s3] sm:$0xff]  ;;  %s2748_s26 = smov 56  }
  0x18   : > { %2428 = vmatprep.subr.mxu1 %v258_v2 }
  0x19   : > { %2429 = vmatpush3.msra.mxu1 %v258_v2 }
  0x1a   : > { %2430 = vmatprep.subr.mxu1 %v257_v3 }
  0x1b   : > { %2431 = vmatpush3.msra.mxu1 %v257_v3 }
  0x1c   : > { %2433 = vmatmul.mubr.msk.f32.vlgmr.msra.gmra.mxu1 %vm268_vm0, %v254_v5 }
  0x1d   : > { %2435 = vmatprep.mubr.msk.f32.mxu1 %vm268_vm0, %v255_v6 }
  0x20   : > { %2436 = vmatmul.mubr.msk.f32.gmra.mxu1 %vm268_vm0, %v256_v7 }
  0xdc   : > { %v2434_v9 = vpop.f32.mrf.mxu1 }
  0xdd   : > { %v353_v10 = vadd.f32 %v2434_v9, %v2274_v8 }
  0xde   : > { %v347_v11 = vpop.f32.mrf.mxu1 }
  0xdf   : > { %368 = vst.msk [vmem:[#allocation2 + $0x8] sm:$0xff] %vm366_vm1, %v353_v10  ;;  %v348_v12 = vadd.f32 %v2274_v8, %v347_v11 }
  0xe0   : > { %v2437_v13 = vpop.f32.mrf.mxu1 }
  0xe1   : > { %367 = vst.msk [vmem:[#allocation2] sm:$0xff] %vm366_vm1, %v348_v12  ;;  %v363_v14 = vadd.f32 %v2437_v13, %v2274_v8 }
  0xe2   : > { %v357_v15 = vpop.f32.mrf.mxu1 }
  0xe3   : > { %370 = vst.msk [vmem:[#allocation2 + $0x18] sm:$0xff] %vm366_vm1, %v363_v14  ;;  %v358_v16 = vadd.f32 %v2274_v8, %v357_v15 }
  0xe5   : > { %369 = vst.msk [vmem:[#allocation2 + $0x10] sm:$0xff] %vm366_vm1, %v358_v16 }
  0xe6   : > { %v2866_v17 = vld [vmem:[#allocation2 + $0x8] sm:$0xff] }
  0xe7   : > { %381 = vrot.lane.b32.xlu0 %v2866_v17, %s2744_s9 }
  0xe8   : > { %v2869_v18 = vld [vmem:[#allocation2] sm:$0xff] }
  0xe9   : > { %2442 = vmatprep.mubr.msk.f32.mxu1 %vm383_vm2, %v2869_v18 }
  0xea   : > { %v2873_v19 = vld [vmem:[#allocation2 + $0x18] sm:$0xff] }
  0xeb   : > { %471 = vrot.lane.b32.xlu1 %v2873_v19, %s2744_s9  ;;  %379 = vrot.lane.b32.xlu0 %v2869_v18, %s2744_s9 }
  0xec   : > { %v2877_v20 = vld [vmem:[#allocation2 + $0x10] sm:$0xff] }
  0xed   : > { %2449 = vmatprep.mubr.msk.f32.mxu0 %vm383_vm2, %v2877_v20 }
  0xef   : > { %469 = vrot.lane.b32.xlu1 %v2877_v20, %s2744_s9  ;;  %s2343_s9 = sshll.u32 %s2816_s25, 9  ;;  %s2758_s25 = smov [#allocation4]  }
  0xf0   : > { %s3118_s12 = scalar_lea.hbm %s3167_s6, %s2343_s9 }
 0x159   : > { %v382_v21 = vpop.permute.xlu0 %381 }
 0x15a   : > { %2438 = vmatprep.subr.msk.mxu1 %vm383_vm2, %v382_v21 }
 0x15b   : > { %2439 = vmatpush3.xpose.msk.msra.mxu1 %vm383_vm2, %v382_v21 }
 0x15d   : > { %v472_v22 = vpop.permute.xlu1 %471  ;;  %v380_v23 = vpop.permute.xlu0 %379 }
 0x15e   : > { %2440 = vmatprep.subr.msk.mxu1 %vm383_vm2, %v380_v23  ;;  %2445 = vmatprep.subr.msk.mxu0 %vm383_vm2, %v472_v22 }
 0x15f   : > { %2441 = vmatpush3.xpose.msk.msra.mxu1 %vm383_vm2, %v380_v23  ;;  %2446 = vmatpush3.xpose.msk.msra.mxu0 %vm383_vm2, %v472_v22  ;;  %v2292_v23 = vld [vmem:[%s3164_s3 + $0x18] sm:$0xff] }
 0x161   : > { %v470_v24 = vpop.permute.xlu1 %469 }
 0x162   : > { %2443 = vmatmul.mubr.msk.f32.vlgmr.msra.gmra.mxu1 %vm383_vm2, %v2866_v17  ;;  %2447 = vmatprep.subr.msk.mxu0 %vm383_vm2, %v470_v24 }
 0x163   : > { %2448 = vmatpush3.xpose.msk.msra.mxu0 %vm383_vm2, %v470_v24 }
 0x166   : > { %2450 = vmatmul.mubr.msk.f32.vlgmr.msra.gmra.mxu0 %vm383_vm2, %v2873_v19 }
 0x222   : > { %v2444_v26 = vpop.f32.mrf.mxu1 }
 0x223   : > { %v464_v28 = vadd.f32 %v2444_v26, %v376_v25 }
 0x224   : > { %v458_v29 = vpop.f32.mrf.mxu1 }
 0x225   : > { %v459_v30 = vadd.f32 %v458_v29, %v375_v27  ;;  %v560_v31 = vsel %vm556_vm3, %v464_v28, -inf }
 0x226   : > { %v2451_v32 = vpop.f32.mrf.mxu0  ;;  %561 = vmax.xlane.f32.xlu1 %v560_v31 }
 0x227   : > { %v557_v33 = vsel %vm556_vm3, %v459_v30, -inf  ;;  %v553_v36 = vadd.f32 %v2451_v32, %v376_v25  ;;  %v2291_v25 = vld [vmem:[%s3164_s3 + $0x10] sm:$0xff] }
 0x228   : > { %v547_v34 = vpop.f32.mrf.mxu0  ;;  %558 = vmax.xlane.f32.xlu0 %v557_v33 }
 0x229   : > { %v548_v35 = vadd.f32 %v547_v34, %v375_v27  ;;  %v566_v38 = vsel %vm556_vm3, %v553_v36, -inf }
 0x22b   : > { %v563_v37 = vsel %vm556_vm3, %v548_v35, -inf }
 0x22c   : > { %564 = vmax.xlane.f32.xlu0 %v563_v37 }
 0x230   : > { %567 = vmax.xlane.f32.xlu0 %v566_v38 }
 0x237   : > { %603 = vrot.lane.b32.xlu1 %v2866_v17, %s2745_s14 }
 0x23b   : > { %690 = vrot.lane.b32.xlu1 %v2873_v19, %s2745_s14 }
 0x23f   : > { %794 = vrot.lane.b32.xlu1 %v2866_v17, %s2746_s15 }
 0x243   : > { %792 = vrot.lane.b32.xlu1 %v2869_v18, %s2746_s15 }
 0x246   : > { %601 = vrot.lane.b32.xlu0 %v2869_v18, %s2745_s14 }
 0x247   : > { %788 = vrot.lane.b32.xlu1 %v2869_v18, %s2747_s16 }
 0x24a   : > { %688 = vrot.lane.b32.xlu0 %v2877_v20, %s2745_s14  ;;  %s2752_s14 = smov 72  }
 0x24e   : > { %887 = vrot.lane.b32.xlu0 %v2873_v19, %s2746_s15 }
 0x2af   : > { %v562_v39 = vpop.xlane.xlu1 %561 }
 0x2b0   : > { %v570_v40 = vsub.f32 %v464_v28, %v562_v39 }
 0x2b1   : > { %v559_v41 = vpop.xlane.xlu0 %558 }
 0x2b2   : > { %v575_v42 = vmul.f32 1.442695, %v570_v40  ;;  %v569_v43 = vsub.f32 %v459_v30, %v559_v41 }
 0x2b3   : > { %v604_v44 = vpop.permute.xlu1 %603 }
 0x2b4   : > { %2618 = vpow2.f32 %v575_v42  ;;  %v573_v45 = vmul.f32 1.442695, %v569_v43  ;;  %2452 = vmatprep.subr.mxu1 %v604_v44 }
 0x2b5   : > { %2453 = vmatpush3.msra.mxu1 %v604_v44  ;;  %v565_v46 = vpop.xlane.xlu0 %564 }
 0x2b6   : > { %2620 = vpow2.f32 %v573_v45  ;;  %v571_v61 = vsub.f32 %v548_v35, %v565_v46 }
 0x2b7   : > { %v691_v47 = vpop.permute.xlu1 %690 }
 0x2b8   : > { %v577_v62 = vmul.f32 1.442695, %v571_v61 }
 0x2b9   : > { %v568_v48 = vpop.xlane.xlu0 %567 }
 0x2ba   : > { %v572_v49 = vsub.f32 %v553_v36, %v568_v48 }
 0x2bb   : > { %v795_v50 = vpop.permute.xlu1 %794 }
 0x2bc   : > { %v579_v51 = vmul.f32 1.442695, %v572_v49  ;;  %2466 = vmatprep.subr.msk.mxu0 %vm383_vm2, %v795_v50 }
 0x2bd   : > { %2467 = vmatpush3.xpose.msk.msra.mxu0 %vm383_vm2, %v795_v50  ;;  %v602_v52 = vpop.permute.xlu0 %601 }
 0x2be   : > { %2622 = vpow2.f32 %v579_v51  ;;  %2454 = vmatprep.subr.mxu1 %v602_v52 }
 0x2bf   : > { %v793_v53 = vpop.permute.xlu1 %792  ;;  %2455 = vmatpush3.msra.mxu1 %v602_v52  ;;  %2624 = vpow2.f32 %v577_v62 }
 0x2c0   : > { %2459 = vmatprep.subr.mxu1 %v691_v47  ;;  %2468 = vmatprep.subr.msk.mxu0 %vm383_vm2, %v793_v53 }
 0x2c1   : > { %v2619_v54 = vpop.eup %2618  ;;  %2469 = vmatpush3.xpose.msk.msra.mxu0 %vm383_vm2, %v793_v53  ;;  %v689_v1 = vpop.permute.xlu0 %688 }
 0x2c2   : > { %v584_v55 = vsel %vm556_vm3, %v2619_v54, 0.0 }
 0x2c3   : > { %v2621_v56 = vpop.eup %2620  ;;  %v789_v57 = vpop.permute.xlu1 %788  ;;  %585 = vadd.xlane.f32.xlu0 %v584_v55 }
 0x2c4   : > { %2470 = vmatprep.mubr.msk.f32.mxu0 %vm383_vm2, %v789_v57  ;;  %v581_v58 = vsel %vm556_vm3, %v2621_v56, 0.0 }
 0x2c5   : > { %582 = vadd.xlane.f32.xlu1 %v581_v58  ;;  %v888_v2 = vpop.permute.xlu0 %887 }
 0x2cb   : > { %v2623_v59 = vpop.eup %2622 }
 0x2cc   : > { %v590_v60 = vsel %vm556_vm3, %v2623_v59, 0.0  ;;  %v2625_v63 = vpop.eup %2624 }
 0x2cd   : > { %591 = vadd.xlane.f32.xlu0 %v590_v60  ;;  %v587_v0 = vsel %vm556_vm3, %v2625_v63, 0.0 }
 0x2d6   : > { %885 = vrot.lane.b32.xlu1 %v2877_v20, %s2746_s15  ;;  %s2753_s15 = smov 104  }
 0x2e3   : > { %790 = vrot.lane.b32.xlu0 %v2866_v17, %s2747_s16 }
 0x2e7   : > { %881 = vrot.lane.b32.xlu0 %v2877_v20, %s2747_s16 }
 0x2fa   : > { %588 = vadd.xlane.f32.xlu1 %v587_v0 }
 0x30b   : > { %883 = vrot.lane.b32.xlu1 %v2873_v19, %s2747_s16  ;;  %s2757_s16 = smov 24  }
 0x34c   : > { %v586_v3 = vpop.xlane.xlu0 %585 }
 0x34d   : > { %2626 = vrcp.f32 %v586_v3 }
 0x34e   : > { %v583_v4 = vpop.xlane.xlu1 %582 }
 0x34f   : > { %2628 = vrcp.f32 %v583_v4 }
 0x352   : > { %v886_v11 = vpop.permute.xlu1 %885 }
 0x356   : > { %v592_v5 = vpop.xlane.xlu0 %591 }
 0x357   : > { %2630 = vrcp.f32 %v592_v5 }
 0x35a   : > { %v791_v6 = vpop.permute.xlu0 %790  ;;  %v2627_v7 = vpop.eup %2626 }
 0x35b   : > { %2471 = vmatmul.mubr.msk.f32.vlgmr.msra.gmra.mxu0 %vm383_vm2, %v791_v6  ;;  %v598_v10 = vmul.f32 %v2627_v7, %v2619_v54 }
 0x35c   : > { %v2629_v8 = vpop.eup %2628 }
 0x35d   : > { %v597_v9 = vmul.f32 %v2629_v8, %v2621_v56 }
 0x35e   : > { %v882_v21 = vpop.permute.xlu0 %881 }
 0x35f   : > { %2456 = vmatprep.mubr.msk.f32.mxu1 %vm556_vm3, %v597_v9 }
 0x360   : > { %2457 = vmatmul.mubr.msk.f32.vlgmr.msra.gmra.mxu1 %vm556_vm3, %v598_v10 }
 0x361   : > { %2460 = vmatpush3.msra.mxu1 %v691_v47 }
 0x362   : > { %2461 = vmatprep.subr.mxu1 %v689_v1 }
 0x363   : > { %2462 = vmatpush3.msra.mxu1 %v689_v1 }
 0x364   : > { %2473 = vmatprep.subr.msk.mxu1 %vm383_vm2, %v888_v2  ;;  %v2631_v13 = vpop.eup %2630 }
 0x365   : > { %v600_v16 = vmul.f32 %v2631_v13, %v2623_v59 }
 0x383   : > { %v589_v12 = vpop.xlane.xlu1 %588 }
 0x384   : > { %2632 = vrcp.f32 %v589_v12 }
 0x387   : > { %v884_v22 = vpop.permute.xlu1 %883 }
 0x391   : > { %v2633_v14 = vpop.eup %2632 }
 0x392   : > { %v599_v15 = vmul.f32 %v2633_v14, %v2625_v63 }
 0x394   : > { %2463 = vmatprep.mubr.msk.f32.mxu1 %vm556_vm3, %v599_v15 }
 0x395   : > { %2464 = vmatmul.mubr.msk.f32.vlgmr.msra.gmra.mxu1 %vm556_vm3, %v600_v16 }
 0x396   : > { %2474 = vmatpush3.xpose.msk.msra.mxu1 %vm383_vm2, %v888_v2  ;;  %2477 = vmatprep.mubr.msk.f32.mxu1 %vm383_vm2, %v882_v21 }
 0x397   : > { %2475 = vmatprep.subr.msk.mxu1 %vm383_vm2, %v886_v11 }
 0x39a   : > { %2476 = vmatpush3.xpose.msk.msra.mxu1 %vm383_vm2, %v886_v11 }
 0x39d   : > { %2478 = vmatmul.mubr.msk.f32.vlgmr.msra.gmra.mxu1 %vm383_vm2, %v884_v22 }
 0x41b   : > { %v2472_v24 = vpop.f32.mrf.mxu0 }
 0x41c   : > { %v876_v26 = vadd.f32 %v2472_v24, %v2292_v23 }
 0x41d   : > { %v870_v27 = vpop.f32.mrf.mxu0 }
 0x41e   : > { %v871_v28 = vadd.f32 %v2291_v25, %v870_v27  ;;  %v975_v29 = vsel %vm556_vm3, %v876_v26, -inf  ;;  %v2306_v27 = vld [vmem:[%s3164_s3 + $0x28] sm:$0xff] }
 0x41f   : > { %976 = vmax.xlane.f32.xlu1 %v975_v29  ;;  %v2305_v29 = vld [vmem:[%s3164_s3 + $0x20] sm:$0xff] }
 0x420   : > { %v2458_v30 = vpop.f32.mrf.mxu1  ;;  %v972_v31 = vsel %vm556_vm3, %v871_v28, -inf }
 0x421   : > { %776 = vst.msk [vmem:[#allocation3 + $0x8] sm:$0xff] %vm383_vm2, %v2458_v30  ;;  %973 = vmax.xlane.f32.xlu0 %v972_v31 }
 0x422   : > { %v679_v32 = vpop.f32.mrf.mxu1 }
 0x423   : > { %775 = vst.msk [vmem:[#allocation3] sm:$0xff] %vm383_vm2, %v679_v32 }
 0x455   : > { %v2465_v33 = vpop.f32.mrf.mxu1 }
 0x456   : > { %778 = vst.msk [vmem:[#allocation3 + $0x18] sm:$0xff] %vm383_vm2, %v2465_v33 }
 0x457   : > { %v766_v34 = vpop.f32.mrf.mxu1 }
 0x458   : > { %777 = vst.msk [vmem:[#allocation3 + $0x10] sm:$0xff] %vm383_vm2, %v766_v34 }
 0x45d   : > { %v2479_v35 = vpop.f32.mrf.mxu1 }
 0x45e   : > { %v969_v38 = vadd.f32 %v2479_v35, %v2292_v23 }
 0x45f   : > { %v963_v36 = vpop.f32.mrf.mxu1 }
 0x460   : > { %v964_v37 = vadd.f32 %v2291_v25, %v963_v36  ;;  %v981_v40 = vsel %vm556_vm3, %v969_v38, -inf }
 0x462   : > { %v978_v39 = vsel %vm556_vm3, %v964_v37, -inf }
 0x463   : > { %979 = vmax.xlane.f32.xlu0 %v978_v39 }
 0x467   : > { %982 = vmax.xlane.f32.xlu0 %v981_v40 }
 0x4a8   : > { %v977_v41 = vpop.xlane.xlu1 %976 }
 0x4a9   : > { %v985_v42 = vsub.f32 %v876_v26, %v977_v41 }
 0x4aa   : > { %v974_v43 = vpop.xlane.xlu0 %973 }
 0x4ab   : > { %v990_v44 = vmul.f32 1.442695, %v985_v42  ;;  %v984_v45 = vsub.f32 %v871_v28, %v974_v43 }
 0x4ad   : > { %2634 = vpow2.f32 %v990_v44  ;;  %v988_v46 = vmul.f32 1.442695, %v984_v45 }
 0x4af   : > { %2636 = vpow2.f32 %v988_v46 }
 0x4ba   : > { %v2635_v47 = vpop.eup %2634 }
 0x4bb   : > { %v999_v48 = vsel %vm556_vm3, %v2635_v47, 0.0 }
 0x4bc   : > { %v2637_v49 = vpop.eup %2636  ;;  %1000 = vadd.xlane.f32.xlu0 %v999_v48 }
 0x4bd   : > { %v996_v50 = vsel %vm556_vm3, %v2637_v49, 0.0 }
 0x4be   : > { %997 = vadd.xlane.f32.xlu1 %v996_v50 }
 0x4cf   : > { %1018 = vrot.lane.b32.xlu1 %v2866_v17, %s2748_s26 }
 0x4d2   : > { %1016 = vrot.lane.b32.xlu0 %v2869_v18, %s2748_s26 }
 0x4d3   : > { %1105 = vrot.lane.b32.xlu1 %v2873_v19, %s2748_s26 }
 0x4d6   : > { %1103 = vrot.lane.b32.xlu0 %v2877_v20, %s2748_s26  ;;  %s2755_s26 = smov 8  }
 0x4d7   : > { %1226 = vrot.lane.b32.xlu1 %v2866_v17, %s2749_s28 }
 0x4da   : > { %1319 = vrot.lane.b32.xlu0 %v2873_v19, %s2749_s28 }
 0x4db   : > { %1224 = vrot.lane.b32.xlu1 %v2869_v18, %s2749_s28 }
 0x4df   : > { %1220 = vrot.lane.b32.xlu1 %v2869_v18, %s2750_s29 }
 0x4e3   : > { %1317 = vrot.lane.b32.xlu1 %v2877_v20, %s2749_s28  ;;  %s2756_s28 = smov 16  }
 0x4ec   : > { %v980_v51 = vpop.xlane.xlu0 %979 }
 0x4ed   : > { %v986_v52 = vsub.f32 %v964_v37, %v980_v51 }
 0x4ef   : > { %v992_v55 = vmul.f32 1.442695, %v986_v52 }
 0x4f0   : > { %v983_v53 = vpop.xlane.xlu0 %982 }
 0x4f1   : > { %v987_v54 = vsub.f32 %v969_v38, %v983_v53 }
 0x4f3   : > { %v994_v56 = vmul.f32 1.442695, %v987_v54 }
 0x4f5   : > { %2638 = vpow2.f32 %v994_v56 }
 0x4f6   : > { %2640 = vpow2.f32 %v992_v55 }
 0x502   : > { %v2639_v57 = vpop.eup %2638 }
 0x503   : > { %v2641_v58 = vpop.eup %2640  ;;  %v1005_v59 = vsel %vm556_vm3, %v2639_v57, 0.0 }
 0x504   : > { %1006 = vadd.xlane.f32.xlu0 %v1005_v59  ;;  %v1002_v60 = vsel %vm556_vm3, %v2641_v58, 0.0 }
 0x507   : > { %1003 = vadd.xlane.f32.xlu1 %v1002_v60 }
 0x518   : > { %1315 = vrot.lane.b32.xlu1 %v2873_v19, %s2750_s29 }
 0x51a   : > { %1222 = vrot.lane.b32.xlu0 %v2866_v17, %s2750_s29 }
 0x51e   : > { %1313 = vrot.lane.b32.xlu0 %v2877_v20, %s2750_s29 }
 0x545   : > { %v1001_v61 = vpop.xlane.xlu0 %1000 }
 0x546   : > { %2642 = vrcp.f32 %v1001_v61 }
 0x547   : > { %v998_v62 = vpop.xlane.xlu1 %997 }
 0x548   : > { %2644 = vrcp.f32 %v998_v62 }
 0x549   : > { %v1017_v63 = vpop.permute.xlu0 %1016 }
 0x54b   : > { %v1019_v0 = vpop.permute.xlu1 %1018 }
 0x54c   : > { %2480 = vmatprep.subr.mxu0 %v1019_v0 }
 0x54d   : > { %2481 = vmatpush3.msra.mxu0 %v1019_v0  ;;  %v1104_v1 = vpop.permute.xlu0 %1103 }
 0x54e   : > { %2482 = vmatprep.subr.mxu0 %v1017_v63 }
 0x54f   : > { %v1106_v2 = vpop.permute.xlu1 %1105  ;;  %2483 = vmatpush3.msra.mxu0 %v1017_v63 }
 0x550   : > { %2487 = vmatprep.subr.mxu1 %v1106_v2 }
 0x551   : > { %2488 = vmatpush3.msra.mxu1 %v1106_v2  ;;  %v1320_v3 = vpop.permute.xlu0 %1319 }
 0x552   : > { %2489 = vmatprep.subr.mxu1 %v1104_v1 }
 0x553   : > { %v1227_v4 = vpop.permute.xlu1 %1226  ;;  %2490 = vmatpush3.msra.mxu1 %v1104_v1  ;;  %v2643_v5 = vpop.eup %2642 }
 0x554   : > { %2494 = vmatprep.subr.msk.mxu0 %vm383_vm2, %v1227_v4  ;;  %2501 = vmatprep.subr.msk.mxu1 %vm383_vm2, %v1320_v3  ;;  %v1013_v9 = vmul.f32 %v2643_v5, %v2635_v47 }
 0x555   : > { %v2645_v6 = vpop.eup %2644 }
 0x556   : > { %v1012_v7 = vmul.f32 %v2645_v6, %v2637_v49 }
 0x557   : > { %v1225_v8 = vpop.permute.xlu1 %1224 }
 0x558   : > { %2484 = vmatprep.mubr.msk.f32.mxu0 %vm556_vm3, %v1012_v7 }
 0x559   : > { %2485 = vmatmul.mubr.msk.f32.vlgmr.msra.gmra.mxu0 %vm556_vm3, %v1013_v9 }
 0x55a   : > { %2495 = vmatpush3.xpose.msk.msra.mxu0 %vm383_vm2, %v1227_v4 }
 0x55b   : > { %2496 = vmatprep.subr.msk.mxu0 %vm383_vm2, %v1225_v8  ;;  %v1221_v10 = vpop.permute.xlu1 %1220 }
 0x55c   : > { %2498 = vmatprep.mubr.msk.f32.mxu0 %vm383_vm2, %v1221_v10 }
 0x55e   : > { %2497 = vmatpush3.xpose.msk.msra.mxu0 %vm383_vm2, %v1225_v8 }
 0x55f   : > { %v1318_v11 = vpop.permute.xlu1 %1317 }
 0x58d   : > { %v1007_v12 = vpop.xlane.xlu0 %1006 }
 0x58e   : > { %2646 = vrcp.f32 %v1007_v12 }
 0x590   : > { %v1004_v13 = vpop.xlane.xlu1 %1003 }
 0x591   : > { %2648 = vrcp.f32 %v1004_v13  ;;  %v1223_v14 = vpop.permute.xlu0 %1222 }
 0x592   : > { %2499 = vmatmul.mubr.msk.f32.vlgmr.msra.gmra.mxu0 %vm383_vm2, %v1223_v14 }
 0x594   : > { %v1316_v24 = vpop.permute.xlu1 %1315 }
 0x595   : > { %v1314_v23 = vpop.permute.xlu0 %1313 }
 0x59b   : > { %v2647_v15 = vpop.eup %2646 }
 0x59c   : > { %v1015_v22 = vmul.f32 %v2647_v15, %v2639_v57 }
 0x59e   : > { %v2649_v16 = vpop.eup %2648 }
 0x59f   : > { %v1014_v21 = vmul.f32 %v2649_v16, %v2641_v58 }
 0x5a1   : > { %2491 = vmatprep.mubr.msk.f32.mxu1 %vm556_vm3, %v1014_v21 }
 0x5a2   : > { %2492 = vmatmul.mubr.msk.f32.vlgmr.msra.gmra.mxu1 %vm556_vm3, %v1015_v22 }
 0x5a3   : > { %2502 = vmatpush3.xpose.msk.msra.mxu1 %vm383_vm2, %v1320_v3  ;;  %2505 = vmatprep.mubr.msk.f32.mxu1 %vm383_vm2, %v1314_v23 }
 0x5a4   : > { %2503 = vmatprep.subr.msk.mxu1 %vm383_vm2, %v1318_v11 }
 0x5a7   : > { %2504 = vmatpush3.xpose.msk.msra.mxu1 %vm383_vm2, %v1318_v11 }
 0x5aa   : > { %2506 = vmatmul.mubr.msk.f32.vlgmr.msra.gmra.mxu1 %vm383_vm2, %v1316_v24 }
 0x619   : > { %v2990_v25 = vpop.f32.mrf.mxu0 }
 0x61b   : > { %v2992_v26 = vpop.f32.mrf.mxu0 }
 0x652   : > { %v2500_v28 = vpop.f32.mrf.mxu0 }
 0x653   : > { %v1308_v30 = vadd.f32 %v2500_v28, %v2306_v27 }
 0x654   : > { %v1302_v31 = vpop.f32.mrf.mxu0 }
 0x655   : > { %v1303_v32 = vadd.f32 %v2305_v29, %v1302_v31  ;;  %v1407_v33 = vsel %vm556_vm3, %v1308_v30, -inf  ;;  %v2320_v31 = vld [vmem:[%s3164_s3 + $0x38] sm:$0xff] }
 0x656   : > { %1408 = vmax.xlane.f32.xlu1 %v1407_v33  ;;  %v2319_v33 = vld [vmem:[%s3164_s3 + $0x30] sm:$0xff] }
 0x657   : > { %v1404_v34 = vsel %vm556_vm3, %v1303_v32, -inf }
 0x658   : > { %1405 = vmax.xlane.f32.xlu0 %v1404_v34 }
 0x662   : > { %v3002_v35 = vpop.f32.mrf.mxu1 }
 0x664   : > { %v3004_v36 = vpop.f32.mrf.mxu1 }
 0x66a   : > { %v2507_v37 = vpop.f32.mrf.mxu1 }
 0x66b   : > { %v1401_v40 = vadd.f32 %v2507_v37, %v2306_v27 }
 0x66c   : > { %v1395_v38 = vpop.f32.mrf.mxu1 }
 0x66d   : > { %v1396_v39 = vadd.f32 %v2305_v29, %v1395_v38  ;;  %v1413_v42 = vsel %vm556_vm3, %v1401_v40, -inf }
 0x66f   : > { %v1410_v41 = vsel %vm556_vm3, %v1396_v39, -inf }
 0x670   : > { %1411 = vmax.xlane.f32.xlu0 %v1410_v41 }
 0x674   : > { %1414 = vmax.xlane.f32.xlu0 %v1413_v42 }
 0x6df   : > { %v1409_v43 = vpop.xlane.xlu1 %1408 }
 0x6e0   : > { %v1417_v44 = vsub.f32 %v1308_v30, %v1409_v43 }
 0x6e1   : > { %v1406_v45 = vpop.xlane.xlu0 %1405 }
 0x6e2   : > { %v1422_v46 = vmul.f32 1.442695, %v1417_v44  ;;  %v1416_v47 = vsub.f32 %v1303_v32, %v1406_v45 }
 0x6e4   : > { %2650 = vpow2.f32 %v1422_v46  ;;  %v1420_v48 = vmul.f32 1.442695, %v1416_v47 }
 0x6e6   : > { %2652 = vpow2.f32 %v1420_v48 }
 0x6f1   : > { %v2651_v49 = vpop.eup %2650 }
 0x6f2   : > { %v1431_v50 = vsel %vm556_vm3, %v2651_v49, 0.0 }
 0x6f3   : > { %v2653_v51 = vpop.eup %2652  ;;  %1432 = vadd.xlane.f32.xlu0 %v1431_v50 }
 0x6f4   : > { %v1428_v52 = vsel %vm556_vm3, %v2653_v51, 0.0 }
 0x6f5   : > { %1429 = vadd.xlane.f32.xlu1 %v1428_v52 }
 0x6f9   : > { %v1412_v53 = vpop.xlane.xlu0 %1411 }
 0x6fa   : > { %v1418_v57 = vsub.f32 %v1396_v39, %v1412_v53 }
 0x6fc   : > { %v1424_v58 = vmul.f32 1.442695, %v1418_v57 }
 0x6fd   : > { %v1415_v54 = vpop.xlane.xlu0 %1414 }
 0x6fe   : > { %v1419_v55 = vsub.f32 %v1401_v40, %v1415_v54 }
 0x700   : > { %v1426_v56 = vmul.f32 1.442695, %v1419_v55 }
 0x702   : > { %2654 = vpow2.f32 %v1426_v56 }
 0x703   : > { %2656 = vpow2.f32 %v1424_v58 }
 0x706   : > { %1450 = vrot.lane.b32.xlu1 %v2866_v17, %s2751_s13 }
 0x709   : > { %1448 = vrot.lane.b32.xlu0 %v2869_v18, %s2751_s13 }
 0x70a   : > { %1537 = vrot.lane.b32.xlu1 %v2873_v19, %s2751_s13 }
 0x70d   : > { %1535 = vrot.lane.b32.xlu0 %v2877_v20, %s2751_s13  ;;  %s3120_s13 = scalar_lea.sflag [#allocation5], %s243_s17 }
 0x70e   : > { %1658 = vrot.lane.b32.xlu1 %v2866_v17, %s2752_s14 }
 0x70f   : > { %v2655_v59 = vpop.eup %2654 }
 0x710   : > { %v1437_v60 = vsel %vm556_vm3, %v2655_v59, 0.0  ;;  %v2657_v61 = vpop.eup %2656 }
 0x711   : > { %1751 = vrot.lane.b32.xlu0 %v2873_v19, %s2752_s14  ;;  %v1434_v62 = vsel %vm556_vm3, %v2657_v61, 0.0 }
 0x712   : > { %1656 = vrot.lane.b32.xlu1 %v2869_v18, %s2752_s14 }
 0x716   : > { %1652 = vrot.lane.b32.xlu1 %v2869_v18, %s2753_s15 }
 0x71a   : > { %1749 = vrot.lane.b32.xlu1 %v2877_v20, %s2752_s14 }
 0x730   : > { %1438 = vadd.xlane.f32.xlu0 %v1437_v60 }
 0x73e   : > { %1435 = vadd.xlane.f32.xlu1 %v1434_v62 }
 0x746   : > { %1654 = vrot.lane.b32.xlu0 %v2866_v17, %s2753_s15 }
 0x74a   : > { %1745 = vrot.lane.b32.xlu0 %v2877_v20, %s2753_s15 }
 0x74f   : > { %1747 = vrot.lane.b32.xlu1 %v2873_v19, %s2753_s15  ;;  %s2686_s15 = sshll.u32 %s2758_s25, 4  ;;  %s2687_s15 = int_to_ptr.vmem [resolvable:$false] %s2686_s15 }
 0x77c   : > { %v1433_v63 = vpop.xlane.xlu0 %1432 }
 0x77d   : > { %2658 = vrcp.f32 %v1433_v63 }
 0x77e   : > { %v1430_v0 = vpop.xlane.xlu1 %1429 }
 0x77f   : > { %2660 = vrcp.f32 %v1430_v0 }
 0x780   : > { %v1449_v1 = vpop.permute.xlu0 %1448 }
 0x782   : > { %v1451_v2 = vpop.permute.xlu1 %1450 }
 0x783   : > { %2508 = vmatprep.subr.mxu0 %v1451_v2 }
 0x784   : > { %2509 = vmatpush3.msra.mxu0 %v1451_v2  ;;  %v1536_v3 = vpop.permute.xlu0 %1535 }
 0x785   : > { %2510 = vmatprep.subr.mxu0 %v1449_v1 }
 0x786   : > { %v1538_v4 = vpop.permute.xlu1 %1537  ;;  %2511 = vmatpush3.msra.mxu0 %v1449_v1 }
 0x787   : > { %2515 = vmatprep.subr.mxu1 %v1538_v4 }
 0x788   : > { %2516 = vmatpush3.msra.mxu1 %v1538_v4  ;;  %v1752_v5 = vpop.permute.xlu0 %1751 }
 0x789   : > { %2517 = vmatprep.subr.mxu1 %v1536_v3 }
 0x78a   : > { %v1659_v6 = vpop.permute.xlu1 %1658  ;;  %2518 = vmatpush3.msra.mxu1 %v1536_v3  ;;  %v2659_v7 = vpop.eup %2658 }
 0x78b   : > { %2522 = vmatprep.subr.msk.mxu0 %vm383_vm2, %v1659_v6  ;;  %2529 = vmatprep.subr.msk.mxu1 %vm383_vm2, %v1752_v5  ;;  %v1445_v11 = vmul.f32 %v2659_v7, %v2651_v49 }
 0x78c   : > { %v2661_v8 = vpop.eup %2660 }
 0x78d   : > { %v1444_v9 = vmul.f32 %v2661_v8, %v2653_v51 }
 0x78e   : > { %v1657_v10 = vpop.permute.xlu1 %1656 }
 0x78f   : > { %2512 = vmatprep.mubr.msk.f32.mxu0 %vm556_vm3, %v1444_v9 }
 0x790   : > { %2513 = vmatmul.mubr.msk.f32.vlgmr.msra.gmra.mxu0 %vm556_vm3, %v1445_v11 }
 0x791   : > { %2523 = vmatpush3.xpose.msk.msra.mxu0 %vm383_vm2, %v1659_v6 }
 0x792   : > { %2524 = vmatprep.subr.msk.mxu0 %vm383_vm2, %v1657_v10  ;;  %v1653_v12 = vpop.permute.xlu1 %1652 }
 0x793   : > { %2526 = vmatprep.mubr.msk.f32.mxu0 %vm383_vm2, %v1653_v12 }
 0x795   : > { %2525 = vmatpush3.xpose.msk.msra.mxu0 %vm383_vm2, %v1657_v10 }
 0x796   : > { %v1750_v15 = vpop.permute.xlu1 %1749 }
 0x7b9   : > { %v1439_v13 = vpop.xlane.xlu0 %1438 }
 0x7ba   : > { %2662 = vrcp.f32 %v1439_v13 }
 0x7bd   : > { %v1655_v14 = vpop.permute.xlu0 %1654 }
 0x7be   : > { %2527 = vmatmul.mubr.msk.f32.vlgmr.msra.gmra.mxu0 %vm383_vm2, %v1655_v14 }
 0x7c1   : > { %v1746_v27 = vpop.permute.xlu0 %1745 }
 0x7c7   : > { %v1436_v16 = vpop.xlane.xlu1 %1435  ;;  %v2663_v21 = vpop.eup %2662 }
 0x7c8   : > { %2664 = vrcp.f32 %v1436_v16  ;;  %v1447_v24 = vmul.f32 %v2663_v21, %v2655_v59 }
 0x7cb   : > { %v1748_v28 = vpop.permute.xlu1 %1747 }
 0x7d5   : > { %v2665_v22 = vpop.eup %2664 }
 0x7d6   : > { %v1446_v23 = vmul.f32 %v2665_v22, %v2657_v61 }
 0x7d8   : > { %2519 = vmatprep.mubr.msk.f32.mxu1 %vm556_vm3, %v1446_v23  ;;  %v2082_v23 = vld [vmem:[%s3165_s4 + $0x18] sm:$0xff] }
 0x7d9   : > { %2520 = vmatmul.mubr.msk.f32.vlgmr.msra.gmra.mxu1 %vm556_vm3, %v1447_v24  ;;  %v2081_v24 = vld [vmem:[%s3165_s4 + $0x10] sm:$0xff] }
 0x7da   : > { %2530 = vmatpush3.xpose.msk.msra.mxu1 %vm383_vm2, %v1752_v5  ;;  %2533 = vmatprep.mubr.msk.f32.mxu1 %vm383_vm2, %v1746_v27  ;;  %v2080_v27 = vld [vmem:[%s3165_s4 + $0x8] sm:$0xff] }
 0x7db   : > { %2531 = vmatprep.subr.msk.mxu1 %vm383_vm2, %v1750_v15 }
 0x7de   : > { %2532 = vmatpush3.xpose.msk.msra.mxu1 %vm383_vm2, %v1750_v15 }
 0x7e1   : > { %2534 = vmatmul.mubr.msk.f32.vlgmr.msra.gmra.mxu1 %vm383_vm2, %v1748_v28  ;;  %v2079_v28 = vld [vmem:[%s3165_s4] sm:$0xff] }
 0x850   : > { %v2514_v29 = vpop.f32.mrf.mxu0 }
 0x852   : > { %v1526_v30 = vpop.f32.mrf.mxu0 }
 0x87e   : > { %v2528_v32 = vpop.f32.mrf.mxu0 }
 0x87f   : > { %v1740_v34 = vadd.f32 %v2528_v32, %v2320_v31 }
 0x880   : > { %v1734_v37 = vpop.f32.mrf.mxu0 }
 0x881   : > { %v1735_v38 = vadd.f32 %v2319_v33, %v1734_v37  ;;  %v1839_v39 = vsel %vm556_vm3, %v1740_v34, -inf }
 0x882   : > { %1840 = vmax.xlane.f32.xlu1 %v1839_v39 }
 0x883   : > { %v1836_v40 = vsel %vm556_vm3, %v1735_v38, -inf }
 0x884   : > { %1837 = vmax.xlane.f32.xlu0 %v1836_v40 }
 0x899   : > { %v3048_v41 = vpop.f32.mrf.mxu1 }
 0x89b   : > { %v3050_v42 = vpop.f32.mrf.mxu1 }
 0x8a1   : > { %v2535_v43 = vpop.f32.mrf.mxu1 }
 0x8a2   : > { %v1833_v46 = vadd.f32 %v2535_v43, %v2320_v31 }
 0x8a3   : > { %v1827_v44 = vpop.f32.mrf.mxu1 }
 0x8a4   : > { %v1828_v45 = vadd.f32 %v2319_v33, %v1827_v44  ;;  %v1845_v48 = vsel %vm556_vm3, %v1833_v46, -inf }
 0x8a6   : > { %v1842_v47 = vsel %vm556_vm3, %v1828_v45, -inf }
 0x8a7   : > { %1843 = vmax.xlane.f32.xlu0 %v1842_v47 }
 0x8ab   : > { %1846 = vmax.xlane.f32.xlu0 %v1845_v48 }
 0x90b   : > { %v1841_v49 = vpop.xlane.xlu1 %1840 }
 0x90c   : > { %v1849_v50 = vsub.f32 %v1740_v34, %v1841_v49 }
 0x90d   : > { %v1838_v51 = vpop.xlane.xlu0 %1837 }
 0x90e   : > { %v1854_v52 = vmul.f32 1.442695, %v1849_v50  ;;  %v1848_v53 = vsub.f32 %v1735_v38, %v1838_v51 }
 0x910   : > { %2666 = vpow2.f32 %v1854_v52  ;;  %v1852_v54 = vmul.f32 1.442695, %v1848_v53 }
 0x912   : > { %2668 = vpow2.f32 %v1852_v54 }
 0x91d   : > { %v2667_v55 = vpop.eup %2666 }
 0x91e   : > { %v1863_v56 = vsel %vm556_vm3, %v2667_v55, 0.0 }
 0x91f   : > { %v2669_v57 = vpop.eup %2668  ;;  %1864 = vadd.xlane.f32.xlu0 %v1863_v56 }
 0x920   : > { %v1860_v58 = vsel %vm556_vm3, %v2669_v57, 0.0 }
 0x921   : > { %1861 = vadd.xlane.f32.xlu1 %v1860_v58 }
 0x930   : > { %v1844_v59 = vpop.xlane.xlu0 %1843 }
 0x931   : > { %v1850_v63 = vsub.f32 %v1828_v45, %v1844_v59  ;;  %v2333_v45 = vld [vmem:[%s3166_s5] ss:$0 sm:$0xff] }
 0x932   : > { %1882 = vrot.lane.b32.xlu1 %v2866_v17, %s2754_s20 }
 0x933   : > { %v1856_v0 = vmul.f32 1.442695, %v1850_v63 }
 0x934   : > { %v1847_v60 = vpop.xlane.xlu0 %1846 }
 0x935   : > { %v1851_v61 = vsub.f32 %v1833_v46, %v1847_v60 }
 0x936   : > { %1969 = vrot.lane.b32.xlu1 %v2873_v19, %s2754_s20 }
 0x937   : > { %v1858_v62 = vmul.f32 1.442695, %v1851_v61 }
 0x939   : > { %2670 = vpow2.f32 %v1858_v62 }
 0x93a   : > { %2672 = vpow2.f32 %v1856_v0 }
 0x946   : > { %v2671_v1 = vpop.eup %2670 }
 0x947   : > { %v1869_v2 = vsel %vm556_vm3, %v2671_v1, 0.0  ;;  %v2673_v3 = vpop.eup %2672 }
 0x948   : > { %1870 = vadd.xlane.f32.xlu0 %v1869_v2  ;;  %v1866_v4 = vsel %vm556_vm3, %v2673_v3, 0.0 }
 0x95a   : > { %1867 = vadd.xlane.f32.xlu1 %v1866_v4 }
 0x95e   : > { %1880 = vrot.lane.b32.xlu0 %v2869_v18, %s2754_s20 }
 0x962   : > { %1194 = vrot.lane.b32.xlu0 %v2992_v26, %s2755_s26 }
 0x966   : > { %1626 = vrot.lane.b32.xlu0 %v1526_v30, %s2756_s28 }
 0x96b   : > { %1967 = vrot.lane.b32.xlu1 %v2877_v20, %s2754_s20 }
 0x96f   : > { %1196 = vrot.lane.b32.xlu1 %v2990_v25, %s2755_s26 }
 0x973   : > { %1628 = vrot.lane.b32.xlu1 %v2514_v29, %s2756_s28 }
 0x9a8   : > { %v1865_v6 = vpop.xlane.xlu0 %1864 }
 0x9aa   : > { %v1862_v17 = vpop.xlane.xlu1 %1861 }
 0x9ab   : > { %2674 = vrcp.f32 %v1862_v17 }
 0x9ac   : > { %2676 = vrcp.f32 %v1865_v6 }
 0x9ae   : > { %v1883_v19 = vpop.permute.xlu1 %1882 }
 0x9af   : > { %2536 = vmatprep.subr.mxu0 %v1883_v19 }
 0x9b0   : > { %2537 = vmatpush3.msra.mxu0 %v1883_v19 }
 0x9b2   : > { %v1970_v18 = vpop.permute.xlu1 %1969 }
 0x9b3   : > { %2543 = vmatprep.subr.mxu1 %v1970_v18 }
 0x9b4   : > { %2544 = vmatpush3.msra.mxu1 %v1970_v18 }
 0x9b8   : > { %v2675_v5 = vpop.eup %2674 }
 0x9b9   : > { %v1876_v26 = vmul.f32 %v2675_v5, %v2669_v57  ;;  %v2677_v7 = vpop.eup %2676 }
 0x9ba   : > { %v1877_v25 = vmul.f32 %v2677_v7, %v2667_v55 }
 0x9bb   : > { %2540 = vmatprep.mubr.msk.f32.mxu0 %vm556_vm3, %v1876_v26 }
 0x9d1   : > { %v1871_v20 = vpop.xlane.xlu0 %1870 }
 0x9d2   : > { %2678 = vrcp.f32 %v1871_v20 }
 0x9d5   : > { %v1881_v8 = vpop.permute.xlu0 %1880 }
 0x9d6   : > { %2538 = vmatprep.subr.mxu0 %v1881_v8 }
 0x9d7   : > { %2539 = vmatpush3.msra.mxu0 %v1881_v8 }
 0x9d8   : > { %2541 = vmatmul.mubr.msk.f32.vlgmr.msra.gmra.mxu0 %vm556_vm3, %v1877_v25  ;;  %2550 = vmatprep.subr.mxu0 %v2082_v23 }
 0x9d9   : > { %v1195_v9 = vpop.permute.xlu0 %1194  ;;  %2551 = vmatpush3.msra.mxu0 %v2082_v23 }
 0x9da   : > { %1207 = vst.msk [vmem:[#allocation3] sm:$0xff] %vm1206_vm4, %v1195_v9  ;;  %2552 = vmatprep.subr.mxu0 %v2081_v24 }
 0x9db   : > { %2553 = vmatpush3.msra.mxu0 %v2081_v24 }
 0x9dc   : > { %2554 = vmatprep.subr.mxu0 %v2080_v27 }
 0x9dd   : > { %v1627_v10 = vpop.permute.xlu0 %1626  ;;  %2555 = vmatpush3.msra.mxu0 %v2080_v27 }
 0x9de   : > { %1639 = vst.msk [vmem:[#allocation3] sm:$0xff] %vm1638_vm5, %v1627_v10  ;;  %2556 = vmatprep.subr.mxu0 %v2079_v28 }
 0x9df   : > { %v2679_v15 = vpop.eup %2678  ;;  %2557 = vmatpush3.msra.mxu0 %v2079_v28 }
 0x9e0   : > { %v1879_v22 = vmul.f32 %v2679_v15, %v2671_v1 }
 0x9e3   : > { %v1868_v11 = vpop.xlane.xlu1 %1867 }
 0x9e4   : > { %2680 = vrcp.f32 %v1868_v11 }
 0x9e7   : > { %v1968_v12 = vpop.permute.xlu1 %1967 }
 0x9e8   : > { %2545 = vmatprep.subr.mxu1 %v1968_v12 }
 0x9e9   : > { %2546 = vmatpush3.msra.mxu1 %v1968_v12 }
 0x9eb   : > { %v1197_v13 = vpop.permute.xlu1 %1196 }
 0x9ec   : > { %1208 = vst.msk [vmem:[#allocation3 + $0x8] sm:$0xff] %vm1206_vm4, %v1197_v13 }
 0x9ef   : > { %v1629_v14 = vpop.permute.xlu1 %1628 }
 0x9f0   : > { %1640 = vst.msk [vmem:[#allocation3 + $0x8] sm:$0xff] %vm1638_vm5, %v1629_v14 }
 0x9f1   : > { %v2681_v16 = vpop.eup %2680 }
 0x9f2   : > { %v1878_v21 = vmul.f32 %v2681_v16, %v2673_v3 }
 0x9f4   : > { %2547 = vmatprep.mubr.msk.f32.mxu1 %vm556_vm3, %v1878_v21 }
 0x9f5   : > { %2548 = vmatmul.mubr.msk.f32.vlgmr.msra.gmra.mxu1 %vm556_vm3, %v1879_v22 }
 0xa98   : > { %v2542_v29 = vpop.f32.mrf.mxu0 }
 0xa99   : > { %2060 = vrot.lane.b32.xlu1 %v2542_v29, %s2757_s16 }
 0xa9a   : > { %v1958_v30 = vpop.f32.mrf.mxu0 }
 0xa9b   : > { %2058 = vrot.lane.b32.xlu0 %v1958_v30, %s2757_s16 }
 0xa9d   : > { %1200 = vrot.lane.b32.xlu1 %v3002_v35, %s2755_s26 }
 0xa9f   : > { %1198 = vrot.lane.b32.xlu0 %v3004_v36, %s2755_s26 }
 0xaa1   : > { %1632 = vrot.lane.b32.xlu1 %v3048_v41, %s2756_s28 }
 0xaa3   : > { %1630 = vrot.lane.b32.xlu0 %v3050_v42, %s2756_s28  ;;  %s245_s28 = scalar_lea.vmem [#allocation4], %s2271_s18 }
 0xaa4   : > { %s2205_s29 = sshll.u32 %s245_s28, 4  ;;  %s3113_s29 = int_to_ptr.vmem [resolvable:$true] %s2205_s29 }
 0xaa5   : > { %s2682_s14 = scalar_lea.vmem %s3113_s29, 512  ;;  %p2689_p0 = scmp.lt.s32.totalorder %s3113_s29, %s2687_s15 }
 0xaa6   : > { %p2683_p11 = scmp.ne.s32.totalorder %s3113_s29, %s2682_s14 }
 0xaa8   : > { %p2684_p12 = pnand %p2683_p11, %p2833_p5 }
 0xaaa   : > { %p2685_p13 = pneg %p2684_p12 }
 0xab5   : > { %v2549_v31 = vpop.f32.mrf.mxu1 }
 0xab6   : > { %2064 = vrot.lane.b32.xlu1 %v2549_v31, %s2757_s16 }
 0xab7   : > { %v2045_v32 = vpop.f32.mrf.mxu1 }
 0xab8   : > { %2062 = vrot.lane.b32.xlu0 %v2045_v32, %s2757_s16  ;;  %s2688_s16 = scalar_lea.vmem %s2687_s15, 1024 }
 0xab9   : > { %p2690_p1 = scmp.lt.s32.totalorder %s2688_s16, %s2682_s14 }
 0xabb   : > { %p2691_p2 = por %p2690_p1, %p2689_p0 }
 0xabd   : > { %p2692_p3 = pnand %p2691_p2, %p2685_p13 }
 0xb0b   : > { %v2061_v33 = vpop.permute.xlu1 %2060 }
 0xb0c   : > { %2072 = vst.msk [vmem:[#allocation3 + $0x8] sm:$0xff] %vm2070_vm6, %v2061_v33 }
 0xb0d   : > { %v2059_v34 = vpop.permute.xlu0 %2058 }
 0xb0e   : > { %2071 = vst.msk [vmem:[#allocation3] sm:$0xff] %vm2070_vm6, %v2059_v34 }
 0xb0f   : > { %v1201_v35 = vpop.permute.xlu1 %1200 }
 0xb10   : > { %1210 = vst.msk [vmem:[#allocation3 + $0x18] sm:$0xff] %vm1206_vm4, %v1201_v35 }
 0xb11   : > { %v1199_v36 = vpop.permute.xlu0 %1198 }
 0xb12   : > { %1209 = vst.msk [vmem:[#allocation3 + $0x10] sm:$0xff] %vm1206_vm4, %v1199_v36 }
 0xb13   : > { %v1633_v37 = vpop.permute.xlu1 %1632  ;;  %v2076_v40 = vld [vmem:[#allocation3 + $0x8] sm:$0xff] }
 0xb14   : > { %1642 = vst.msk [vmem:[#allocation3 + $0x18] sm:$0xff] %vm1638_vm5, %v1633_v37 }
 0xb15   : > { %v1631_v38 = vpop.permute.xlu0 %1630  ;;  %v2075_v39 = vld [vmem:[#allocation3] sm:$0xff] }
 0xb16   : > { %1641 = vst.msk [vmem:[#allocation3 + $0x10] sm:$0xff] %vm1638_vm5, %v1631_v38  ;;  %2558 = vmatprep.mubr.msk.f32.mxu0 %vm268_vm0, %v2075_v39 }
 0xb17   : > { %2559 = vmatmul.mubr.msk.f32.vlgmr.msra.gmra.mxu0 %vm268_vm0, %v2076_v40 }
 0xb28   : > { %v2065_v41 = vpop.permute.xlu1 %2064 }
 0xb29   : > { %2074 = vst.msk [vmem:[#allocation3 + $0x18] sm:$0xff] %vm2070_vm6, %v2065_v41 }
 0xb2a   : > { %v2063_v42 = vpop.permute.xlu0 %2062 }
 0xb2b   : > { %2073 = vst.msk [vmem:[#allocation3 + $0x10] sm:$0xff] %vm2070_vm6, %v2063_v42 }
 0xb30   : > { %v2078_v44 = vld [vmem:[#allocation3 + $0x18] sm:$0xff] }
 0xb32   : > { %v2077_v43 = vld [vmem:[#allocation3 + $0x10] sm:$0xff] }
 0xb33   : > { %2561 = vmatprep.mubr.msk.f32.mxu0 %vm268_vm0, %v2077_v43 }
 0xb34   : > { %2562 = vmatmul.mubr.msk.f32.gmra.mxu0 %vm268_vm0, %v2078_v44 }
 0xbd7   : > { %v2560_v46 = vpop.f32.mrf.mxu0 }
 0xbd8   : > { %v2174_v47 = vadd.f32 %v2560_v46, %v2333_v45 }
 0xbd9   : > { %v2168_v48 = vpop.f32.mrf.mxu0 }
 0xbda   : > { %2188 = vst [vmem:[%s245_s28 + $0x8] sm:$0xff] %v2174_v47  ;;  %v2169_v49 = vadd.f32 %v2333_v45, %v2168_v48 }
 0xbdc   : > { %2187 = vst [vmem:[%s245_s28] sm:$0xff] %v2169_v49 }
 0xbf4   : > { %v2563_v50 = vpop.f32.mrf.mxu0 }
 0xbf5   : > { %v2184_v51 = vadd.f32 %v2563_v50, %v2333_v45 }
 0xbf6   : > { %v2178_v52 = vpop.f32.mrf.mxu0 }
 0xbf7   : > { %2190 = vst [vmem:[%s245_s28 + $0x18] sm:$0xff] %v2184_v51  ;;  %v2179_v53 = vadd.f32 %v2333_v45, %v2178_v52 }
 0xbf9   : > { %2189 = vst [vmem:[%s245_s28 + $0x10] sm:$0xff] %v2179_v53 }
 0xbfa   : > { %2695 = shalt.err (!%p2692_p3)
}
 0xbfb   : > { %s2696_s17 = scalar_lea.hbm %s3118_s12, 512  ;;  %s2700_s20 = scalar_lea.hbm %s3167_s6, 2048 }
 0xbfc   : > { %p2697_p4 = scmp.ne.s32.totalorder %s3118_s12, %s2696_s17  ;;  %p2701_p9 = scmp.lt.s32.totalorder %s3118_s12, %s3167_s6 }
 0xbfd   : > { %p2702_p10 = scmp.lt.s32.totalorder %s2700_s20, %s2696_s17 }
 0xbfe   : > { %p2698_p7 = pnand %p2697_p4, %p2833_p5 }
 0xbff   : > { %p2703_p11 = por %p2702_p10, %p2701_p9 }
 0xc00   : > { %p2699_p8 = pneg %p2698_p7 }
 0xc02   : > { %p2704_p12 = pnand %p2703_p11, %p2699_p8 }
 0xc04   : > { %2707 = shalt.err (!%p2704_p12)
}
 0xc05   : > { %s2759_s10 = smov 128  }
 0xc06   : > { %2564 = dma.vmem_to_hbm [thread:$0]  (%p2833_p5), %s3113_s29, 512, %s3118_s12, %s3120_s13, %s2759_s10, %s2759_s10, %s2755_s26  }
 0xc07 PF: > { %p2570_p13 = scmp.ge.s32.totalorder %s2742_s24, 2  ;;  %s2220_s11 = sand.u32 1, %s2730_s21  }
 0xc08   : > { %s2221_s14 = scalar_lea.sflag [#allocation5], %s2220_s11 }
 0xc09   : > { %p2567_p0 = pnand %p2570_p13, %p2837_p6 }
 0xc0b   : > { %p2568_p1 = pneg %p2567_p0 }
 0xc0d   : > { %2725 = dma.done.wait (%p2568_p1), %s2221_s14, 512  }
 0xc0e   : > { %2727 = vsyncadd (%p2568_p1), %s2221_s14, 4294966784  ;;  %p16_p2 = scmp.ge.s32.totalorder %s2820_s27, 6   ;;  %s3170_s21 = smov %s2734_s22 }
 0xc0f   : > { %s3171_s22 = smov %s2738_s23  ;;  %s3172_s23 = smov %s2831_s30 }
 0xc10   : > { %s3173_s24 = smov %s2820_s27  ;;  %18 = sbr.rel (!%p16_p2) target bundleno = 3 (0x3), region = 82 }
 0xc15   :  { %2226 = vsyncpa [#allocation5], 1 }
 0xc16   :  { %2228 = vsyncpa [#allocation5 + $0x1], 1 }

</bundles_post_ra>
